<compile_context>
chip_gen: v7x
topology: tpu7x:2x2x1
jax: 0.10.0
libtpu: 0.0.40
codegen_flags: <defaults>
</compile_context>

<pallas_src>
import functools

import jax
import jax.numpy as jnp
from jax.experimental import pallas as pl
from jax.experimental.pallas import tpu as pltpu


# ----------------------------------------------------------------------------
# Pallas kernels
# ----------------------------------------------------------------------------
def _conv_mm_kernel(x_ref, w_ref, b_ref, o_ref, *, apply_tanh):
    """One M-tile of conv-as-matmul: [TM, K](bf16) @ [K, Cout](bf16) -> f32 acc."""
    acc = jnp.dot(x_ref[...], w_ref[...], preferred_element_type=jnp.float32)
    acc = acc + b_ref[...]
    if apply_tanh:
        acc = jnp.tanh(acc)
    o_ref[...] = acc.astype(o_ref.dtype)


def _conv_bn_tanh_kernel(x_ref, w_ref, b_ref, g_ref, bt_ref, o_ref, *, eps):
    """Conv-as-matmul fused with training-mode BatchNorm (batch statistics,
    biased variance, numerically-safe two-pass) and tanh.  Requires grid=(1,)
    so the full (N*OH*OW, Cout) activation is resident for the statistics."""
    acc = jnp.dot(x_ref[...], w_ref[...], preferred_element_type=jnp.float32)
    acc = acc + b_ref[...]
    inv_m = 1.0 / acc.shape[0]
    mean = jnp.sum(acc, axis=0, keepdims=True) * inv_m
    d = acc - mean
    var = jnp.sum(d * d, axis=0, keepdims=True) * inv_m       # two-pass: no cancellation
    y = d * jax.lax.rsqrt(var + eps) * g_ref[...] + bt_ref[...]
    o_ref[...] = jnp.tanh(y).astype(o_ref.dtype)
    # TODO(synk): BatchNorm running_mean/running_var buffer updates (module
    # state side effects) are not reproduced; forward output is unaffected.


def _conv_head_kernel(p_ref, wc_ref, bc_ref, w1_ref, b1_ref,
                      w2_ref, b2_ref, w3_ref, b3_ref, o_ref):
    """Fused enc3 conv + tanh + NHWC flatten + Linear -> Linear -> Linear.

    p_ref : [P, N, K]   per-output-spatial-position patch slabs (bf16)
    wc_ref: [K, Cout]   conv3 weight (bf16);       bc_ref: [1, Cout]
    w1_ref: [P, Cout, D1] lin1 weight split per position so the flatten is an
                          accumulation (no lane-crossing reshape in-kernel).
    """
    n = p_ref.shape[1]
    n_pos = p_ref.shape[0]
    d1 = w1_ref.shape[2]
    h1 = jnp.zeros((n, d1), jnp.float32)
    for p in range(n_pos):                                     # static, unrolled tap loop
        t = jnp.tanh(
            jnp.dot(p_ref[p], wc_ref[...], preferred_element_type=jnp.float32)
            + bc_ref[...])
        h1 = h1 + jnp.dot(t, w1_ref[p], preferred_element_type=jnp.float32)
    h1 = h1 + b1_ref[...]
    h2 = jnp.dot(h1, w2_ref[...], preferred_element_type=jnp.float32) + b2_ref[...]
    out = jnp.dot(h2, w3_ref[...], preferred_element_type=jnp.float32) + b3_ref[...]
    o_ref[...] = out.astype(o_ref.dtype)


# ----------------------------------------------------------------------------
# Patch extraction (XLA side)
# ----------------------------------------------------------------------------
# TODO(synk): im2col stays host/XLA-side; a fully in-kernel strided window
# gather needs rank-collapsing strided VMEM loads that do not lower reliably
# in Mosaic, so the fused conv-as-matmul form is kept.
def _extract_patches(x, kh, kw, stride):
    """NHWC -> [M, K] patches with K ordered (kh, kw, cin)."""
    n, h, w, cin = x.shape
    oh = (h - kh) // stride + 1
    ow = (w - kw) // stride + 1
    taps = []
    for i in range(kh):
        for j in range(kw):
            taps.append(x[:, i:i + stride * (oh - 1) + 1:stride,
                            j:j + stride * (ow - 1) + 1:stride, :])
    patches = jnp.stack(taps, axis=3).reshape(n * oh * ow, kh * kw * cin)
    return patches, oh, ow


# ----------------------------------------------------------------------------
# Wrappers around pallas_call
# ----------------------------------------------------------------------------
def conv2d_tanh_nhwc(x, w_km, b_row, *, kh=4, kw=4, stride=2):
    """Conv2d (4x4, stride 2, valid) + bias + tanh on NHWC input."""
    n, h, w, cin = x.shape
    k, cout = w_km.shape
    patches, oh, ow = _extract_patches(x, kh, kw, stride)
    m = patches.shape[0]
    # Single full-M tile whenever it fits (it always does for this model:
    # [450, 48] bf16 ~ 42 KB).  Tile only for very large M; per-step overhead
    # amortization matters far more than VMEM here on every generation.
    tm = m if m <= 1024 else 1024
    grid_m = pl.cdiv(m, tm)
    out = pl.pallas_call(
        functools.partial(_conv_mm_kernel, apply_tanh=True),
        grid=(grid_m,),
        in_specs=[
            pl.BlockSpec((tm, k), lambda mi: (mi, 0)),
            pl.BlockSpec((k, cout), lambda mi: (0, 0)),
            pl.BlockSpec((1, cout), lambda mi: (0, 0)),
        ],
        out_specs=pl.BlockSpec((tm, cout), lambda mi: (mi, 0)),
        out_shape=jax.ShapeDtypeStruct((m, cout), x.dtype),
        compiler_params=pltpu.CompilerParams(dimension_semantics=("parallel",)),
    )(patches, w_km, b_row)
    return out.reshape(n, oh, ow, cout)


def conv2d_bn_tanh_nhwc(x, w_km, b_row, gamma_row, beta_row,
                        *, kh=4, kw=4, stride=2, eps=1e-5):
    """Conv2d + training-mode BatchNorm2d (batch statistics) + tanh, one call."""
    n, h, w, cin = x.shape
    k, cout = w_km.shape
    patches, oh, ow = _extract_patches(x, kh, kw, stride)
    m = patches.shape[0]
    # BN batch statistics need the full (N, OH, OW) extent resident in VMEM.
    assert m <= 4096, "fused conv+BN kernel requires the full batch tile in VMEM"
    out = pl.pallas_call(
        functools.partial(_conv_bn_tanh_kernel, eps=eps),
        grid=(1,),
        in_specs=[
            pl.BlockSpec((m, k), lambda i: (0, 0)),
            pl.BlockSpec((k, cout), lambda i: (0, 0)),
            pl.BlockSpec((1, cout), lambda i: (0, 0)),
            pl.BlockSpec((1, cout), lambda i: (0, 0)),
            pl.BlockSpec((1, cout), lambda i: (0, 0)),
        ],
        out_specs=pl.BlockSpec((m, cout), lambda i: (0, 0)),
        out_shape=jax.ShapeDtypeStruct((m, cout), x.dtype),
    )(patches, w_km, b_row, gamma_row, beta_row)
    return out.reshape(n, oh, ow, cout)


def conv3_mlp_head(x, wc, bc, w1, b1, w2, b2, w3, b3, *, kh=4, kw=4, stride=2):
    """Fused enc3 conv + tanh + flatten + Linear(lin_in,128) -> Linear(128,enc)
    -> Linear(64,outputs).  One pallas_call, grid=(1,); total weight footprint
    ~190 KB, trivially VMEM-resident on v5e/v6e/v7x."""
    n, h, w, cin = x.shape
    k, cout = wc.shape
    oh = (h - kh) // stride + 1
    ow = (w - kw) // stride + 1
    npos = oh * ow
    # Per-output-position patch slabs, [P, N, K], K ordered (kh, kw, cin).
    slabs = []
    for i in range(oh):
        for j in range(ow):
            slabs.append(
                x[:, i * stride:i * stride + kh, j * stride:j * stride + kw, :]
                .reshape(n, k))
    p3 = jnp.stack(slabs, axis=0)                              # [P, N, K] bf16
    d1, d2, d3 = w1.shape[2], w2.shape[1], w3.shape[1]
    return pl.pallas_call(
        _conv_head_kernel,
        grid=(1,),
        in_specs=[
            pl.BlockSpec((npos, n, k), lambda i: (0, 0, 0)),
            pl.BlockSpec((k, cout), lambda i: (0, 0)),
            pl.BlockSpec((1, cout), lambda i: (0, 0)),
            pl.BlockSpec((npos, cout, d1), lambda i: (0, 0, 0)),
            pl.BlockSpec((1, d1), lambda i: (0, 0)),
            pl.BlockSpec((d1, d2), lambda i: (0, 0)),
            pl.BlockSpec((1, d2), lambda i: (0, 0)),
            pl.BlockSpec((d2, d3), lambda i: (0, 0)),
            pl.BlockSpec((1, d3), lambda i: (0, 0)),
        ],
        out_specs=pl.BlockSpec((n, d3), lambda i: (0, 0)),
        out_shape=jax.ShapeDtypeStruct((n, d3), jnp.float32),
    )(p3, wc, bc, w1, b1, w2, b2, w3, b3)


# ----------------------------------------------------------------------------
# Model: deterministic parameter init + one-time layout prep + forward
# ----------------------------------------------------------------------------
def init_params(key, encoded_space_dim, jj, kk, outputs_a):
    """PyTorch-layout ([Cout,Cin,KH,KW] / [out,in]) float32 parameters."""
    ch1, ch2, ch3 = 16, 32, 64
    ks = jax.random.split(key, 12)

    def u(k, shape, fan_in):
        bound = 1.0 / float(fan_in) ** 0.5
        return jax.random.uniform(k, shape, jnp.float32, -bound, bound)

    lin_in = ch3 * jj * kk
    return {
        "enc1_w": u(ks[0], (ch1, 3, 4, 4), 3 * 16),
        "enc1_b": u(ks[1], (ch1,), 3 * 16),
        "enc2_w": u(ks[2], (ch2, ch1, 4, 4), ch1 * 16),
        "enc2_b": u(ks[3], (ch2,), ch1 * 16),
        "bn_gamma": jnp.ones((ch2,), jnp.float32),
        "bn_beta": jnp.zeros((ch2,), jnp.float32),
        "enc3_w": u(ks[4], (ch3, ch2, 4, 4), ch2 * 16),
        "enc3_b": u(ks[5], (ch3,), ch2 * 16),
        "lin1_w": u(ks[6], (128, lin_in), lin_in),
        "lin1_b": u(ks[7], (128,), lin_in),
        "lin2_w": u(ks[8], (encoded_space_dim, 128), 128),
        "lin2_b": u(ks[9], (encoded_space_dim,), 128),
        "cls_w": u(ks[10], (outputs_a, 64), 64),
        "cls_b": u(ks[11], (outputs_a,), 64),
    }


def prepare_params(raw, jj, kk):
    """One-time conversion to kernel-ready layouts (no per-step pads/transposes):
    conv weights -> [KH*KW*Cin, Cout] bf16 (HWIO-flattened); lin1 weight split
    per output spatial position -> [P, Cout3, 128] f32 (matches the NHWC
    position-wise accumulation in the fused head kernel); other linear weights
    -> [in, out] f32; biases / BN affine params -> [1, n] f32."""
    def conv_w(w):
        cout, cin, khh, kww = w.shape
        return jnp.transpose(w, (2, 3, 1, 0)).reshape(khh * kww * cin, cout).astype(jnp.bfloat16)

    def row(v):
        return v.reshape(1, -1).astype(jnp.float32)

    ch3 = raw["enc3_w"].shape[0]
    d1 = raw["lin1_w"].shape[0]
    # PyTorch flatten order is (c, h, w); regroup columns per spatial position
    # p = h*kk + w so the head kernel consumes conv3 output position-by-position.
    w1 = raw["lin1_w"].T.reshape(ch3, jj, kk, d1)                      # (c, h, w, out)
    w1 = jnp.transpose(w1, (1, 2, 0, 3)).reshape(jj * kk, ch3, d1)     # (p, c, out)

    return {
        "enc1_w": conv_w(raw["enc1_w"]), "enc1_b": row(raw["enc1_b"]),
        "enc2_w": conv_w(raw["enc2_w"]), "enc2_b": row(raw["enc2_b"]),
        "bn_gamma": row(raw["bn_gamma"]), "bn_beta": row(raw["bn_beta"]),
        "enc3_w": conv_w(raw["enc3_w"]), "enc3_b": row(raw["enc3_b"]),
        "lin1_w": w1.astype(jnp.float32), "lin1_b": row(raw["lin1_b"]),
        "lin2_w": raw["lin2_w"].T.astype(jnp.float32), "lin2_b": row(raw["lin2_b"]),
        "cls_w": raw["cls_w"].T.astype(jnp.float32), "cls_b": row(raw["cls_b"]),
    }


def cnn_forward(params, x_nchw):
    # Single layout change at the model boundary: NCHW (PyTorch) -> NHWC, bf16.
    x = jnp.transpose(x_nchw, (0, 2, 3, 1)).astype(jnp.bfloat16)
    x = conv2d_tanh_nhwc(x, params["enc1_w"], params["enc1_b"])                # enc1 + tanh
    x = conv2d_bn_tanh_nhwc(x, params["enc2_w"], params["enc2_b"],             # enc2 + BN + tanh
                            params["bn_gamma"], params["bn_beta"])
    return conv3_mlp_head(x, params["enc3_w"], params["enc3_b"],               # enc3 + tanh +
                          params["lin1_w"], params["lin1_b"],                  # flatten + 3 Linears
                          params["lin2_w"], params["lin2_b"],
                          params["cls_w"], params["cls_b"])


if __name__ == "__main__":
    # Input 32x32 -> 15x15 -> 6x6 -> 2x2, so jj = kk = 2.
    # classifier is Linear(64, OUTPUTS_a) => encoded_space_dim must equal 64.
    encoded_space_dim, jj, kk, outputs_a = 64, 2, 2, 10
    key = jax.random.PRNGKey(0)
    k_params, k_x = jax.random.split(key)
    raw_params = init_params(k_params, encoded_space_dim, jj, kk, outputs_a)
    params = prepare_params(raw_params, jj, kk)
    x = jax.random.normal(k_x, (2, 3, 32, 32), jnp.float32)

    fwd = jax.jit(cnn_forward)
    out = jax.block_until_ready(fwd(params, x))
    assert out.shape == (2, outputs_a), out.shape
    assert bool(jnp.all(jnp.isfinite(out)))
    print("KERNEL_OK")
</pallas_src>

<mosaic_0001>
module attributes {stable_mosaic.version = 11 : i64} {
  func.func @_conv_mm_kernel(%arg0: i32, %arg1: memref<450x48xbf16, #tpu.memory_space<vmem>>, %arg2: memref<48x16xbf16, #tpu.memory_space<vmem>>, %arg3: memref<1x16xf32, #tpu.memory_space<vmem>>, %arg4: memref<450x16xbf16, #tpu.memory_space<vmem>>) attributes {dimension_semantics = [#tpu.dimension_semantics<parallel>], iteration_bounds = array<i64: 1>, scalar_prefetch = 0 : i64, scratch_operands = 0 : i64, tpu.core_type = #tpu.core_type<tc>, window_params = [{transform_indices = @transform_0, window_bounds = array<i64: 450, 48>}, {pipeline_mode = #tpu.pipeline_mode<synchronous>, transform_indices = @transform_1, window_bounds = array<i64: 48, 16>}, {pipeline_mode = #tpu.pipeline_mode<synchronous>, transform_indices = @transform_2, window_bounds = array<i64: 1, 16>}, {transform_indices = @transform_3, window_bounds = array<i64: 450, 16>}]} {
    %c0 = arith.constant 0 : index
    %c0_0 = arith.constant 0 : index
    %0 = vector.load %arg1[%c0, %c0_0] : memref<450x48xbf16, #tpu.memory_space<vmem>>, vector<450x48xbf16>
    %c0_1 = arith.constant 0 : index
    %c0_2 = arith.constant 0 : index
    %1 = vector.load %arg2[%c0_1, %c0_2] : memref<48x16xbf16, #tpu.memory_space<vmem>>, vector<48x16xbf16>
    %cst = arith.constant dense<0.000000e+00> : vector<450x16xf32>
    %2 = tpu.matmul %0, %1, %cst {dimension_numbers = #tpu.dot_dimension_numbers<[1], [0], [0], [1], [0, 0, 1, 1], [], []>} : vector<450x48xbf16>, vector<48x16xbf16>, vector<450x16xf32> -> vector<450x16xf32>
    %c0_3 = arith.constant 0 : index
    %c0_4 = arith.constant 0 : index
    %3 = vector.load %arg3[%c0_3, %c0_4] : memref<1x16xf32, #tpu.memory_space<vmem>>, vector<1x16xf32>
    %4 = vector.broadcast %3 : vector<1x16xf32> to vector<450x16xf32>
    %5 = arith.addf %2, %4 : vector<450x16xf32>
    %6 = math.tanh %5 : vector<450x16xf32>
    %7 = arith.truncf %6 : vector<450x16xf32> to vector<450x16xbf16>
    %c0_5 = arith.constant 0 : index
    %c0_6 = arith.constant 0 : index
    %8 = vector.load %arg4[%c0_5, %c0_6] : memref<450x16xbf16, #tpu.memory_space<vmem>>, vector<450x16xbf16>
    tpu.vector_store %arg4[%c0_5, %c0_6], %7 {strides = array<i32>} : memref<450x16xbf16, #tpu.memory_space<vmem>>, vector<450x16xbf16>,
    return
  }
  func.func @transform_0(%arg0: i32) -> (i32, i32) {
    %c0_i32 = arith.constant 0 : i32
    %c0_i32_0 = arith.constant 0 : i32
    return %arg0, %c0_i32 : i32, i32
  }
  func.func @transform_1(%arg0: i32) -> (i32, i32) {
    %c0_i32 = arith.constant 0 : i32
    %c0_i32_0 = arith.constant 0 : i32
    %c0_i32_1 = arith.constant 0 : i32
    return %c0_i32, %c0_i32_0 : i32, i32
  }
  func.func @transform_2(%arg0: i32) -> (i32, i32) {
    %c0_i32 = arith.constant 0 : i32
    %c0_i32_0 = arith.constant 0 : i32
    %c0_i32_1 = arith.constant 0 : i32
    return %c0_i32, %c0_i32_0 : i32, i32
  }
  func.func @transform_3(%arg0: i32) -> (i32, i32) {
    %c0_i32 = arith.constant 0 : i32
    %c0_i32_0 = arith.constant 0 : i32
    return %arg0, %c0_i32 : i32, i32
  }
}

module attributes {stable_mosaic.version = 11 : i64} {
  func.func @_conv_bn_tanh_kernel(%arg0: i32, %arg1: memref<72x256xbf16, #tpu.memory_space<vmem>>, %arg2: memref<256x32xbf16, #tpu.memory_space<vmem>>, %arg3: memref<1x32xf32, #tpu.memory_space<vmem>>, %arg4: memref<1x32xf32, #tpu.memory_space<vmem>>, %arg5: memref<1x32xf32, #tpu.memory_space<vmem>>, %arg6: memref<72x32xbf16, #tpu.memory_space<vmem>>) attributes {dimension_semantics = [#tpu.dimension_semantics<arbitrary>], iteration_bounds = array<i64: 1>, scalar_prefetch = 0 : i64, scratch_operands = 0 : i64, tpu.core_type = #tpu.core_type<tc>, window_params = [{pipeline_mode = #tpu.pipeline_mode<synchronous>, transform_indices = @transform_0, window_bounds = array<i64: 72, 256>}, {pipeline_mode = #tpu.pipeline_mode<synchronous>, transform_indices = @transform_1, window_bounds = array<i64: 256, 32>}, {pipeline_mode = #tpu.pipeline_mode<synchronous>, transform_indices = @transform_2, window_bounds = array<i64: 1, 32>}, {pipeline_mode = #tpu.pipeline_mode<synchronous>, transform_indices = @transform_3, window_bounds = array<i64: 1, 32>}, {pipeline_mode = #tpu.pipeline_mode<synchronous>, transform_indices = @transform_4, window_bounds = array<i64: 1, 32>}, {pipeline_mode = #tpu.pipeline_mode<synchronous>, transform_indices = @transform_5, window_bounds = array<i64: 72, 32>}]} {
    %c0 = arith.constant 0 : index
    %c0_0 = arith.constant 0 : index
    %0 = vector.load %arg1[%c0, %c0_0] : memref<72x256xbf16, #tpu.memory_space<vmem>>, vector<72x256xbf16>
    %c0_1 = arith.constant 0 : index
    %c0_2 = arith.constant 0 : index
    %1 = vector.load %arg2[%c0_1, %c0_2] : memref<256x32xbf16, #tpu.memory_space<vmem>>, vector<256x32xbf16>
    %cst = arith.constant dense<0.000000e+00> : vector<72x32xf32>
    %2 = tpu.matmul %0, %1, %cst {dimension_numbers = #tpu.dot_dimension_numbers<[1], [0], [0], [1], [0, 0, 1, 1], [], []>} : vector<72x256xbf16>, vector<256x32xbf16>, vector<72x32xf32> -> vector<72x32xf32>
    %c0_3 = arith.constant 0 : index
    %c0_4 = arith.constant 0 : index
    %3 = vector.load %arg3[%c0_3, %c0_4] : memref<1x32xf32, #tpu.memory_space<vmem>>, vector<1x32xf32>
    %4 = vector.broadcast %3 : vector<1x32xf32> to vector<72x32xf32>
    %5 = arith.addf %2, %4 : vector<72x32xf32>
    %cst_5 = arith.constant dense<0.000000e+00> : vector<32xf32>
    %6 = vector.multi_reduction <add>, %5, %cst_5 [0] : vector<72x32xf32> to vector<32xf32>
    %7 = vector.shape_cast %6 : vector<32xf32> to vector<1x32xf32>
    %cst_6 = arith.constant 0.013888889 : f32
    %8 = vector.broadcast %cst_6 : f32 to vector<1x32xf32>
    %9 = arith.mulf %7, %8 : vector<1x32xf32>
    %10 = vector.broadcast %9 : vector<1x32xf32> to vector<72x32xf32>
    %11 = arith.subf %5, %10 : vector<72x32xf32>
    %12 = arith.mulf %11, %11 : vector<72x32xf32>
    %cst_7 = arith.constant dense<0.000000e+00> : vector<32xf32>
    %13 = vector.multi_reduction <add>, %12, %cst_7 [0] : vector<72x32xf32> to vector<32xf32>
    %14 = vector.shape_cast %13 : vector<32xf32> to vector<1x32xf32>
    %cst_8 = arith.constant 0.013888889 : f32
    %15 = vector.broadcast %cst_8 : f32 to vector<1x32xf32>
    %16 = arith.mulf %14, %15 : vector<1x32xf32>
    %cst_9 = arith.constant 9.99999974E-6 : f32
    %17 = vector.broadcast %cst_9 : f32 to vector<1x32xf32>
    %18 = arith.addf %16, %17 : vector<1x32xf32>
    %19 = math.rsqrt %18 : vector<1x32xf32>
    %20 = vector.broadcast %19 : vector<1x32xf32> to vector<72x32xf32>
    %21 = arith.mulf %11, %20 : vector<72x32xf32>
    %c0_10 = arith.constant 0 : index
    %c0_11 = arith.constant 0 : index
    %22 = vector.load %arg4[%c0_10, %c0_11] : memref<1x32xf32, #tpu.memory_space<vmem>>, vector<1x32xf32>
    %23 = vector.broadcast %22 : vector<1x32xf32> to vector<72x32xf32>
    %24 = arith.mulf %21, %23 : vector<72x32xf32>
    %c0_12 = arith.constant 0 : index
    %c0_13 = arith.constant 0 : index
    %25 = vector.load %arg5[%c0_12, %c0_13] : memref<1x32xf32, #tpu.memory_space<vmem>>, vector<1x32xf32>
    %26 = vector.broadcast %25 : vector<1x32xf32> to vector<72x32xf32>
    %27 = arith.addf %24, %26 : vector<72x32xf32>
    %28 = math.tanh %27 : vector<72x32xf32>
    %29 = arith.truncf %28 : vector<72x32xf32> to vector<72x32xbf16>
    %c0_14 = arith.constant 0 : index
    %c0_15 = arith.constant 0 : index
    %30 = vector.load %arg6[%c0_14, %c0_15] : memref<72x32xbf16, #tpu.memory_space<vmem>>, vector<72x32xbf16>
    tpu.vector_store %arg6[%c0_14, %c0_15], %29 {strides = array<i32>} : memref<72x32xbf16, #tpu.memory_space<vmem>>, vector<72x32xbf16>,
    return
  }
  func.func @transform_0(%arg0: i32) -> (i32, i32) {
    %c0_i32 = arith.constant 0 : i32
    %c0_i32_0 = arith.constant 0 : i32
    %c0_i32_1 = arith.constant 0 : i32
    return %c0_i32, %c0_i32_0 : i32, i32
  }
  func.func @transform_1(%arg0: i32) -> (i32, i32) {
    %c0_i32 = arith.constant 0 : i32
    %c0_i32_0 = arith.constant 0 : i32
    %c0_i32_1 = arith.constant 0 : i32
    return %c0_i32, %c0_i32_0 : i32, i32
  }
  func.func @transform_2(%arg0: i32) -> (i32, i32) {
    %c0_i32 = arith.constant 0 : i32
    %c0_i32_0 = arith.constant 0 : i32
    %c0_i32_1 = arith.constant 0 : i32
    return %c0_i32, %c0_i32_0 : i32, i32
  }
  func.func @transform_3(%arg0: i32) -> (i32, i32) {
    %c0_i32 = arith.constant 0 : i32
    %c0_i32_0 = arith.constant 0 : i32
    %c0_i32_1 = arith.constant 0 : i32
    return %c0_i32, %c0_i32_0 : i32, i32
  }
  func.func @transform_4(%arg0: i32) -> (i32, i32) {
    %c0_i32 = arith.constant 0 : i32
    %c0_i32_0 = arith.constant 0 : i32
    %c0_i32_1 = arith.constant 0 : i32
    return %c0_i32, %c0_i32_0 : i32, i32
  }
  func.func @transform_5(%arg0: i32) -> (i32, i32) {
    %c0_i32 = arith.constant 0 : i32
    %c0_i32_0 = arith.constant 0 : i32
    %c0_i32_1 = arith.constant 0 : i32
    return %c0_i32, %c0_i32_0 : i32, i32
  }
}

module attributes {stable_mosaic.version = 11 : i64} {
  func.func @_conv_head_kernel(%arg0: i32, %arg1: memref<4x2x512xbf16, #tpu.memory_space<vmem>>, %arg2: memref<512x64xbf16, #tpu.memory_space<vmem>>, %arg3: memref<1x64xf32, #tpu.memory_space<vmem>>, %arg4: memref<4x64x128xf32, #tpu.memory_space<vmem>>, %arg5: memref<1x128xf32, #tpu.memory_space<vmem>>, %arg6: memref<128x64xf32, #tpu.memory_space<vmem>>, %arg7: memref<1x64xf32, #tpu.memory_space<vmem>>, %arg8: memref<64x10xf32, #tpu.memory_space<vmem>>, %arg9: memref<1x10xf32, #tpu.memory_space<vmem>>, %arg10: memref<2x10xf32, #tpu.memory_space<vmem>>) attributes {dimension_semantics = [#tpu.dimension_semantics<arbitrary>], iteration_bounds = array<i64: 1>, scalar_prefetch = 0 : i64, scratch_operands = 0 : i64, tpu.core_type = #tpu.core_type<tc>, window_params = [{pipeline_mode = #tpu.pipeline_mode<synchronous>, transform_indices = @transform_0, window_bounds = array<i64: 4, 2, 512>}, {pipeline_mode = #tpu.pipeline_mode<synchronous>, transform_indices = @transform_1, window_bounds = array<i64: 512, 64>}, {pipeline_mode = #tpu.pipeline_mode<synchronous>, transform_indices = @transform_2, window_bounds = array<i64: 1, 64>}, {pipeline_mode = #tpu.pipeline_mode<synchronous>, transform_indices = @transform_3, window_bounds = array<i64: 4, 64, 128>}, {pipeline_mode = #tpu.pipeline_mode<synchronous>, transform_indices = @transform_4, window_bounds = array<i64: 1, 128>}, {pipeline_mode = #tpu.pipeline_mode<synchronous>, transform_indices = @transform_5, window_bounds = array<i64: 128, 64>}, {pipeline_mode = #tpu.pipeline_mode<synchronous>, transform_indices = @transform_6, window_bounds = array<i64: 1, 64>}, {pipeline_mode = #tpu.pipeline_mode<synchronous>, transform_indices = @transform_7, window_bounds = array<i64: 64, 10>}, {pipeline_mode = #tpu.pipeline_mode<synchronous>, transform_indices = @transform_8, window_bounds = array<i64: 1, 10>}, {pipeline_mode = #tpu.pipeline_mode<synchronous>, transform_indices = @transform_9, window_bounds = array<i64: 2, 10>}]} {
    %cst = arith.constant 0.000000e+00 : f32
    %0 = vector.broadcast %cst : f32 to vector<2x128xf32>
    %c0 = arith.constant 0 : index
    %c0_0 = arith.constant 0 : index
    %c0_1 = arith.constant 0 : index
    %1 = vector.load %arg1[%c0, %c0_0, %c0_1] : memref<4x2x512xbf16, #tpu.memory_space<vmem>>, vector<1x2x512xbf16>
    %2 = vector.shape_cast %1 : vector<1x2x512xbf16> to vector<2x512xbf16>
    %c0_2 = arith.constant 0 : index
    %c0_3 = arith.constant 0 : index
    %3 = vector.load %arg2[%c0_2, %c0_3] : memref<512x64xbf16, #tpu.memory_space<vmem>>, vector<512x64xbf16>
    %cst_4 = arith.constant dense<0.000000e+00> : vector<2x64xf32>
    %4 = tpu.matmul %2, %3, %cst_4 {dimension_numbers = #tpu.dot_dimension_numbers<[1], [0], [0], [1], [0, 0, 1, 1], [], []>} : vector<2x512xbf16>, vector<512x64xbf16>, vector<2x64xf32> -> vector<2x64xf32>
    %c0_5 = arith.constant 0 : index
    %c0_6 = arith.constant 0 : index
    %5 = vector.load %arg3[%c0_5, %c0_6] : memref<1x64xf32, #tpu.memory_space<vmem>>, vector<1x64xf32>
    %6 = vector.broadcast %5 : vector<1x64xf32> to vector<2x64xf32>
    %7 = arith.addf %4, %6 : vector<2x64xf32>
    %8 = math.tanh %7 : vector<2x64xf32>
    %c0_7 = arith.constant 0 : index
    %c0_8 = arith.constant 0 : index
    %c0_9 = arith.constant 0 : index
    %9 = vector.load %arg4[%c0_7, %c0_8, %c0_9] : memref<4x64x128xf32, #tpu.memory_space<vmem>>, vector<1x64x128xf32>
    %10 = vector.shape_cast %9 : vector<1x64x128xf32> to vector<64x128xf32>
    %cst_10 = arith.constant dense<0.000000e+00> : vector<2x128xf32>
    %11 = tpu.matmul %8, %10, %cst_10 {dimension_numbers = #tpu.dot_dimension_numbers<[1], [0], [0], [1], [0, 0, 1, 1], [], []>} : vector<2x64xf32>, vector<64x128xf32>, vector<2x128xf32> -> vector<2x128xf32>
    %12 = arith.addf %0, %11 : vector<2x128xf32>
    %c1 = arith.constant 1 : index
    %c0_11 = arith.constant 0 : index
    %c0_12 = arith.constant 0 : index
    %13 = vector.load %arg1[%c1, %c0_11, %c0_12] : memref<4x2x512xbf16, #tpu.memory_space<vmem>>, vector<1x2x512xbf16>
    %14 = vector.shape_cast %13 : vector<1x2x512xbf16> to vector<2x512xbf16>
    %c0_13 = arith.constant 0 : index
    %c0_14 = arith.constant 0 : index
    %15 = vector.load %arg2[%c0_13, %c0_14] : memref<512x64xbf16, #tpu.memory_space<vmem>>, vector<512x64xbf16>
    %cst_15 = arith.constant dense<0.000000e+00> : vector<2x64xf32>
    %16 = tpu.matmul %14, %15, %cst_15 {dimension_numbers = #tpu.dot_dimension_numbers<[1], [0], [0], [1], [0, 0, 1, 1], [], []>} : vector<2x512xbf16>, vector<512x64xbf16>, vector<2x64xf32> -> vector<2x64xf32>
    %c0_16 = arith.constant 0 : index
    %c0_17 = arith.constant 0 : index
    %17 = vector.load %arg3[%c0_16, %c0_17] : memref<1x64xf32, #tpu.memory_space<vmem>>, vector<1x64xf32>
    %18 = vector.broadcast %17 : vector<1x64xf32> to vector<2x64xf32>
    %19 = arith.addf %16, %18 : vector<2x64xf32>
    %20 = math.tanh %19 : vector<2x64xf32>
    %c1_18 = arith.constant 1 : index
    %c0_19 = arith.constant 0 : index
    %c0_20 = arith.constant 0 : index
    %21 = vector.load %arg4[%c1_18, %c0_19, %c0_20] : memref<4x64x128xf32, #tpu.memory_space<vmem>>, vector<1x64x128xf32>
    %22 = vector.shape_cast %21 : vector<1x64x128xf32> to vector<64x128xf32>
    %cst_21 = arith.constant dense<0.000000e+00> : vector<2x128xf32>
    %23 = tpu.matmul %20, %22, %cst_21 {dimension_numbers = #tpu.dot_dimension_numbers<[1], [0], [0], [1], [0, 0, 1, 1], [], []>} : vector<2x64xf32>, vector<64x128xf32>, vector<2x128xf32> -> vector<2x128xf32>
    %24 = arith.addf %12, %23 : vector<2x128xf32>
    %c2 = arith.constant 2 : index
    %c0_22 = arith.constant 0 : index
    %c0_23 = arith.constant 0 : index
    %25 = vector.load %arg1[%c2, %c0_22, %c0_23] : memref<4x2x512xbf16, #tpu.memory_space<vmem>>, vector<1x2x512xbf16>
    %26 = vector.shape_cast %25 : vector<1x2x512xbf16> to vector<2x512xbf16>
    %c0_24 = arith.constant 0 : index
    %c0_25 = arith.constant 0 : index
    %27 = vector.load %arg2[%c0_24, %c0_25] : memref<512x64xbf16, #tpu.memory_space<vmem>>, vector<512x64xbf16>
    %cst_26 = arith.constant dense<0.000000e+00> : vector<2x64xf32>
    %28 = tpu.matmul %26, %27, %cst_26 {dimension_numbers = #tpu.dot_dimension_numbers<[1], [0], [0], [1], [0, 0, 1, 1], [], []>} : vector<2x512xbf16>, vector<512x64xbf16>, vector<2x64xf32> -> vector<2x64xf32>
    %c0_27 = arith.constant 0 : index
    %c0_28 = arith.constant 0 : index
    %29 = vector.load %arg3[%c0_27, %c0_28] : memref<1x64xf32, #tpu.memory_space<vmem>>, vector<1x64xf32>
    %30 = vector.broadcast %29 : vector<1x64xf32> to vector<2x64xf32>
    %31 = arith.addf %28, %30 : vector<2x64xf32>
    %32 = math.tanh %31 : vector<2x64xf32>
    %c2_29 = arith.constant 2 : index
    %c0_30 = arith.constant 0 : index
    %c0_31 = arith.constant 0 : index
    %33 = vector.load %arg4[%c2_29, %c0_30, %c0_31] : memref<4x64x128xf32, #tpu.memory_space<vmem>>, vector<1x64x128xf32>
    %34 = vector.shape_cast %33 : vector<1x64x128xf32> to vector<64x128xf32>
    %cst_32 = arith.constant dense<0.000000e+00> : vector<2x128xf32>
    %35 = tpu.matmul %32, %34, %cst_32 {dimension_numbers = #tpu.dot_dimension_numbers<[1], [0], [0], [1], [0, 0, 1, 1], [], []>} : vector<2x64xf32>, vector<64x128xf32>, vector<2x128xf32> -> vector<2x128xf32>
    %36 = arith.addf %24, %35 : vector<2x128xf32>
    %c3 = arith.constant 3 : index
    %c0_33 = arith.constant 0 : index
    %c0_34 = arith.constant 0 : index
    %37 = vector.load %arg1[%c3, %c0_33, %c0_34] : memref<4x2x512xbf16, #tpu.memory_space<vmem>>, vector<1x2x512xbf16>
    %38 = vector.shape_cast %37 : vector<1x2x512xbf16> to vector<2x512xbf16>
    %c0_35 = arith.constant 0 : index
    %c0_36 = arith.constant 0 : index
    %39 = vector.load %arg2[%c0_35, %c0_36] : memref<512x64xbf16, #tpu.memory_space<vmem>>, vector<512x64xbf16>
    %cst_37 = arith.constant dense<0.000000e+00> : vector<2x64xf32>
    %40 = tpu.matmul %38, %39, %cst_37 {dimension_numbers = #tpu.dot_dimension_numbers<[1], [0], [0], [1], [0, 0, 1, 1], [], []>} : vector<2x512xbf16>, vector<512x64xbf16>, vector<2x64xf32> -> vector<2x64xf32>
    %c0_38 = arith.constant 0 : index
    %c0_39 = arith.constant 0 : index
    %41 = vector.load %arg3[%c0_38, %c0_39] : memref<1x64xf32, #tpu.memory_space<vmem>>, vector<1x64xf32>
    %42 = vector.broadcast %41 : vector<1x64xf32> to vector<2x64xf32>
    %43 = arith.addf %40, %42 : vector<2x64xf32>
    %44 = math.tanh %43 : vector<2x64xf32>
    %c3_40 = arith.constant 3 : index
    %c0_41 = arith.constant 0 : index
    %c0_42 = arith.constant 0 : index
    %45 = vector.load %arg4[%c3_40, %c0_41, %c0_42] : memref<4x64x128xf32, #tpu.memory_space<vmem>>, vector<1x64x128xf32>
    %46 = vector.shape_cast %45 : vector<1x64x128xf32> to vector<64x128xf32>
    %cst_43 = arith.constant dense<0.000000e+00> : vector<2x128xf32>
    %47 = tpu.matmul %44, %46, %cst_43 {dimension_numbers = #tpu.dot_dimension_numbers<[1], [0], [0], [1], [0, 0, 1, 1], [], []>} : vector<2x64xf32>, vector<64x128xf32>, vector<2x128xf32> -> vector<2x128xf32>
    %48 = arith.addf %36, %47 : vector<2x128xf32>
    %c0_44 = arith.constant 0 : index
    %c0_45 = arith.constant 0 : index
    %49 = vector.load %arg5[%c0_44, %c0_45] : memref<1x128xf32, #tpu.memory_space<vmem>>, vector<1x128xf32>
    %50 = vector.broadcast %49 : vector<1x128xf32> to vector<2x128xf32>
    %51 = arith.addf %48, %50 : vector<2x128xf32>
    %c0_46 = arith.constant 0 : index
    %c0_47 = arith.constant 0 : index
    %52 = vector.load %arg6[%c0_46, %c0_47] : memref<128x64xf32, #tpu.memory_space<vmem>>, vector<128x64xf32>
    %cst_48 = arith.constant dense<0.000000e+00> : vector<2x64xf32>
    %53 = tpu.matmul %51, %52, %cst_48 {dimension_numbers = #tpu.dot_dimension_numbers<[1], [0], [0], [1], [0, 0, 1, 1], [], []>} : vector<2x128xf32>, vector<128x64xf32>, vector<2x64xf32> -> vector<2x64xf32>
    %c0_49 = arith.constant 0 : index
    %c0_50 = arith.constant 0 : index
    %54 = vector.load %arg7[%c0_49, %c0_50] : memref<1x64xf32, #tpu.memory_space<vmem>>, vector<1x64xf32>
    %55 = vector.broadcast %54 : vector<1x64xf32> to vector<2x64xf32>
    %56 = arith.addf %53, %55 : vector<2x64xf32>
    %c0_51 = arith.constant 0 : index
    %c0_52 = arith.constant 0 : index
    %57 = vector.load %arg8[%c0_51, %c0_52] : memref<64x10xf32, #tpu.memory_space<vmem>>, vector<64x10xf32>
    %cst_53 = arith.constant dense<0.000000e+00> : vector<2x10xf32>
    %58 = tpu.matmul %56, %57, %cst_53 {dimension_numbers = #tpu.dot_dimension_numbers<[1], [0], [0], [1], [0, 0, 1, 1], [], []>} : vector<2x64xf32>, vector<64x10xf32>, vector<2x10xf32> -> vector<2x10xf32>
    %c0_54 = arith.constant 0 : index
    %c0_55 = arith.constant 0 : index
    %59 = vector.load %arg9[%c0_54, %c0_55] : memref<1x10xf32, #tpu.memory_space<vmem>>, vector<1x10xf32>
    %60 = vector.broadcast %59 : vector<1x10xf32> to vector<2x10xf32>
    %61 = arith.addf %58, %60 : vector<2x10xf32>
    %c0_56 = arith.constant 0 : index
    %c0_57 = arith.constant 0 : index
    %62 = vector.load %arg10[%c0_56, %c0_57] : memref<2x10xf32, #tpu.memory_space<vmem>>, vector<2x10xf32>
    tpu.vector_store %arg10[%c0_56, %c0_57], %61 {strides = array<i32>} : memref<2x10xf32, #tpu.memory_space<vmem>>, vector<2x10xf32>,
    return
  }
  func.func @transform_0(%arg0: i32) -> (i32, i32, i32) {
    %c0_i32 = arith.constant 0 : i32
    %c0_i32_0 = arith.constant 0 : i32
    %c0_i32_1 = arith.constant 0 : i32
    %c0_i32_2 = arith.constant 0 : i32
    return %c0_i32, %c0_i32_0, %c0_i32_1 : i32, i32, i32
  }
  func.func @transform_1(%arg0: i32) -> (i32, i32) {
    %c0_i32 = arith.constant 0 : i32
    %c0_i32_0 = arith.constant 0 : i32
    %c0_i32_1 = arith.constant 0 : i32
    return %c0_i32, %c0_i32_0 : i32, i32
  }
  func.func @transform_2(%arg0: i32) -> (i32, i32) {
    %c0_i32 = arith.constant 0 : i32
    %c0_i32_0 = arith.constant 0 : i32
    %c0_i32_1 = arith.constant 0 : i32
    return %c0_i32, %c0_i32_0 : i32, i32
  }
  func.func @transform_3(%arg0: i32) -> (i32, i32, i32) {
    %c0_i32 = arith.constant 0 : i32
    %c0_i32_0 = arith.constant 0 : i32
    %c0_i32_1 = arith.constant 0 : i32
    %c0_i32_2 = arith.constant 0 : i32
    return %c0_i32, %c0_i32_0, %c0_i32_1 : i32, i32, i32
  }
  func.func @transform_4(%arg0: i32) -> (i32, i32) {
    %c0_i32 = arith.constant 0 : i32
    %c0_i32_0 = arith.constant 0 : i32
    %c0_i32_1 = arith.constant 0 : i32
    return %c0_i32, %c0_i32_0 : i32, i32
  }
  func.func @transform_5(%arg0: i32) -> (i32, i32) {
    %c0_i32 = arith.constant 0 : i32
    %c0_i32_0 = arith.constant 0 : i32
    %c0_i32_1 = arith.constant 0 : i32
    return %c0_i32, %c0_i32_0 : i32, i32
  }
  func.func @transform_6(%arg0: i32) -> (i32, i32) {
    %c0_i32 = arith.constant 0 : i32
    %c0_i32_0 = arith.constant 0 : i32
    %c0_i32_1 = arith.constant 0 : i32
    return %c0_i32, %c0_i32_0 : i32, i32
  }
  func.func @transform_7(%arg0: i32) -> (i32, i32) {
    %c0_i32 = arith.constant 0 : i32
    %c0_i32_0 = arith.constant 0 : i32
    %c0_i32_1 = arith.constant 0 : i32
    return %c0_i32, %c0_i32_0 : i32, i32
  }
  func.func @transform_8(%arg0: i32) -> (i32, i32) {
    %c0_i32 = arith.constant 0 : i32
    %c0_i32_0 = arith.constant 0 : i32
    %c0_i32_1 = arith.constant 0 : i32
    return %c0_i32, %c0_i32_0 : i32, i32
  }
  func.func @transform_9(%arg0: i32) -> (i32, i32) {
    %c0_i32 = arith.constant 0 : i32
    %c0_i32_0 = arith.constant 0 : i32
    %c0_i32_1 = arith.constant 0 : i32
    return %c0_i32, %c0_i32_0 : i32, i32
  }
}

</mosaic_0001>

<bundles_post_ra>
// kernel: cnn_forward.3
= control target key start
LH: loop header
LB: loop body
LE: loop exit
PB: predicated region body
PF: predicated region fallthrough
CT: control target
= control target key end

     0   :  { %v1431_v0 = vmov 0.0   ;;  %vm1432_vm0 = vmmov 0   ;;  %vm246_vm1 = vcmask 392192   ;;  %vm884_vm2 = vcmask 125952   ;;  %s1931_s1 = inlined_call_operand.vmem [shape: bf16[48,16], index: 1, kind: input, shape index: {}]   ;;  %s1932_s0 = inlined_call_operand.vmem [shape: bf16[450,48], index: 0, kind: input, shape index: {}]   ;;  %s1933_s2 = inlined_call_operand.vmem [shape: f32[1,16], index: 2, kind: input, shape index: {}]   ;;  %s1934_s3 = inlined_call_operand.vmem [shape: bf16[450,16], index: 3, kind: output, shape index: {}]  }
   0x1   :  { %1155 = vmatprep.subr.bf16.mxu0 %v1431_v0  ;;  %v1285_v1 = vld [vmem:[%s1931_s1] sm:$0xff]   ;;  %1277 = vmatprep.subr.bf16.mxu1 %v1431_v0  ;;  %v1286_v2 = vld [vmem:[%s1931_s1 + $0x8] sm:$0xff]   ;;  %v1287_v3 = vld [vmem:[%s1931_s1 + $0x10] sm:$0xff]   ;;  %vm941_vm3 = vcmask 122880  }
   0x2   :  { %1161 = vmatprep.mubr.msk.bf16.mxu0 %vm1432_vm0, %v1431_v0  ;;  %1221 = vmatprep.mubr.msk.bf16.mxu1 %vm1432_vm0, %v1431_v0  ;;  %v1288_v4 = vld [vmem:[%s1932_s0] sm:$0xff]   ;;  %v1289_v5 = vld [vmem:[%s1932_s0 + $0x78] sm:$0xff]   ;;  %v1290_v6 = vld [vmem:[%s1932_s0 + $0x8] sm:$0xff]  }
   0x3   :  { %1156 = vmatpush3.bf16.msra.mxu0 %v1285_v1  ;;  %1280 = vmatpush3.bf16.msra.mxu1 %v1285_v1  ;;  %v1291_v7 = vld [vmem:[%s1932_s0 + $0x80] sm:$0xff]   ;;  %v1292_v8 = vld [vmem:[%s1932_s0 + $0x10] sm:$0xff]   ;;  %v1293_v9 = vld [vmem:[%s1932_s0 + $0x88] sm:$0xff]  }
   0x4   :  { %1157 = vmatprep.subr.bf16.mxu0 %v1431_v0  ;;  %1278 = vmatprep.subr.bf16.mxu1 %v1431_v0  ;;  %v1294_v10 = vld [vmem:[%s1932_s0 + $0x18] sm:$0xff]   ;;  %v1295_v11 = vld [vmem:[%s1932_s0 + $0x90] sm:$0xff]   ;;  %v1296_v12 = vld [vmem:[%s1932_s0 + $0x20] sm:$0xff]  }
   0x5   :  { %v1297_v13 = vld [vmem:[%s1932_s0 + $0x98] sm:$0xff]   ;;  %v1298_v14 = vld [vmem:[%s1932_s0 + $0x28] sm:$0xff]   ;;  %v1299_v15 = vld [vmem:[%s1932_s0 + $0xa0] sm:$0xff]  }
   0x6   :  { %v1300_v16 = vld [vmem:[%s1932_s0 + $0x30] sm:$0xff]   ;;  %v1301_v17 = vld [vmem:[%s1932_s0 + $0xa8] sm:$0xff]   ;;  %v1302_v18 = vld [vmem:[%s1932_s0 + $0x38] sm:$0xff]  }
   0x7   :  { %1158 = vmatpush3.bf16.msra.mxu0 %v1286_v2  ;;  %1281 = vmatpush3.bf16.msra.mxu1 %v1286_v2  ;;  %v1303_v19 = vld [vmem:[%s1932_s0 + $0xb0] sm:$0xff]   ;;  %v1304_v20 = vld [vmem:[%s1932_s0 + $0x40] sm:$0xff]   ;;  %v1305_v21 = vld [vmem:[%s1932_s0 + $0xb8] sm:$0xff]  }
   0x8   :  { %1159 = vmatprep.subr.bf16.mxu0 %v1431_v0  ;;  %1279 = vmatprep.subr.bf16.mxu1 %v1431_v0  ;;  %v1306_v22 = vld [vmem:[%s1932_s0 + $0x48] sm:$0xff]   ;;  %v1307_v23 = vld [vmem:[%s1932_s0 + $0xc0] sm:$0xff]   ;;  %v1308_v24 = vld [vmem:[%s1932_s0 + $0x50] sm:$0xff]  }
   0x9   :  { %v1309_v25 = vld [vmem:[%s1932_s0 + $0xc8] sm:$0xff]   ;;  %v1310_v26 = vld [vmem:[%s1932_s0 + $0x58] sm:$0xff]   ;;  %v1311_v27 = vld [vmem:[%s1932_s0 + $0xd0] sm:$0xff]  }
   0xa   :  { %v1312_v28 = vld [vmem:[%s1932_s0 + $0x60] sm:$0xff]   ;;  %v1313_v29 = vld [vmem:[%s1932_s0 + $0xd8] sm:$0xff]   ;;  %v1314_v30 = vld [vmem:[%s1932_s0 + $0x68] sm:$0xff]  }
   0xb   :  { %1160 = vmatpush3.bf16.msra.mxu0 %v1287_v3  ;;  %1282 = vmatpush3.bf16.msra.mxu1 %v1287_v3  ;;  %v1315_v31 = vld [vmem:[%s1932_s0 + $0xe0] ss:$0 sps:$4 sm:$0x11]   ;;  %v1316_v32 = vld [vmem:[%s1932_s0 + $0x70] sm:$0xff]  }
   0xc   :  { %v1645_v33 = vld [vmem:[%s1933_s2] ss:$0 sm:$0xff] }
   0xe   :  { %1162 = vmatmul.mubr.msk.bf16.vlgmr.msra.gmra.mrb[0].mxu0 %vm246_vm1, %v1288_v4  ;;  %1222 = vmatmul.mubr.msk.bf16.vlgmr.msra.gmra.mrb[0].mxu1 %vm246_vm1, %v1289_v5 }
   0xf   :  { %1165 = vmatprep.mubr.msk.bf16.mxu0 %vm1432_vm0, %v1431_v0  ;;  %1225 = vmatprep.mubr.msk.bf16.mxu1 %vm1432_vm0, %v1431_v0 }
  0x16   :  { %1166 = vmatmul.mubr.msk.bf16.gmra.mrb[4].mxu0 %vm246_vm1, %v1290_v6  ;;  %1226 = vmatmul.mubr.msk.bf16.gmra.mrb[4].mxu1 %vm246_vm1, %v1291_v7 }
  0x17   :  { %1169 = vmatprep.mubr.msk.bf16.mxu0 %vm1432_vm0, %v1431_v0  ;;  %1229 = vmatprep.mubr.msk.bf16.mxu1 %vm1432_vm0, %v1431_v0 }
  0x1e   :  { %1170 = vmatmul.mubr.msk.bf16.gmra.mrb[8].mxu0 %vm246_vm1, %v1292_v8  ;;  %1230 = vmatmul.mubr.msk.bf16.gmra.mrb[8].mxu1 %vm246_vm1, %v1293_v9 }
  0x1f   :  { %1173 = vmatprep.mubr.msk.bf16.mxu0 %vm1432_vm0, %v1431_v0  ;;  %1233 = vmatprep.mubr.msk.bf16.mxu1 %vm1432_vm0, %v1431_v0 }
  0x26   :  { %1174 = vmatmul.mubr.msk.bf16.gmra.mrb[12].mxu0 %vm246_vm1, %v1294_v10  ;;  %1234 = vmatmul.mubr.msk.bf16.gmra.mrb[12].mxu1 %vm246_vm1, %v1295_v11 }
  0x27   :  { %1177 = vmatprep.mubr.msk.bf16.mxu0 %vm1432_vm0, %v1431_v0  ;;  %1237 = vmatprep.mubr.msk.bf16.mxu1 %vm1432_vm0, %v1431_v0 }
  0x2e   :  { %1178 = vmatmul.mubr.msk.bf16.gmra.mrb[16].mxu0 %vm246_vm1, %v1296_v12  ;;  %1238 = vmatmul.mubr.msk.bf16.gmra.mrb[16].mxu1 %vm246_vm1, %v1297_v13 }
  0x2f   :  { %1181 = vmatprep.mubr.msk.bf16.mxu0 %vm1432_vm0, %v1431_v0  ;;  %1241 = vmatprep.mubr.msk.bf16.mxu1 %vm1432_vm0, %v1431_v0 }
  0x36   :  { %1182 = vmatmul.mubr.msk.bf16.gmra.mrb[20].mxu0 %vm246_vm1, %v1298_v14  ;;  %1242 = vmatmul.mubr.msk.bf16.gmra.mrb[20].mxu1 %vm246_vm1, %v1299_v15 }
  0x37   :  { %1185 = vmatprep.mubr.msk.bf16.mxu0 %vm1432_vm0, %v1431_v0  ;;  %1245 = vmatprep.mubr.msk.bf16.mxu1 %vm1432_vm0, %v1431_v0 }
  0x3e   :  { %1186 = vmatmul.mubr.msk.bf16.gmra.mrb[24].mxu0 %vm246_vm1, %v1300_v16  ;;  %1246 = vmatmul.mubr.msk.bf16.gmra.mrb[24].mxu1 %vm246_vm1, %v1301_v17 }
  0x3f   :  { %1189 = vmatprep.mubr.msk.bf16.mxu0 %vm1432_vm0, %v1431_v0  ;;  %1249 = vmatprep.mubr.msk.bf16.mxu1 %vm1432_vm0, %v1431_v0 }
  0x46   :  { %1190 = vmatmul.mubr.msk.bf16.gmra.mrb[28].mxu0 %vm246_vm1, %v1302_v18  ;;  %1250 = vmatmul.mubr.msk.bf16.gmra.mrb[28].mxu1 %vm246_vm1, %v1303_v19 }
  0x47   :  { %1193 = vmatprep.mubr.msk.bf16.mxu0 %vm1432_vm0, %v1431_v0  ;;  %1253 = vmatprep.mubr.msk.bf16.mxu1 %vm1432_vm0, %v1431_v0 }
  0x4e   :  { %1194 = vmatmul.mubr.msk.bf16.gmra.mrb[32].mxu0 %vm246_vm1, %v1304_v20  ;;  %1254 = vmatmul.mubr.msk.bf16.gmra.mrb[32].mxu1 %vm246_vm1, %v1305_v21 }
  0x4f   :  { %1197 = vmatprep.mubr.msk.bf16.mxu0 %vm1432_vm0, %v1431_v0  ;;  %1257 = vmatprep.mubr.msk.bf16.mxu1 %vm1432_vm0, %v1431_v0 }
  0x56   :  { %1198 = vmatmul.mubr.msk.bf16.gmra.mrb[36].mxu0 %vm246_vm1, %v1306_v22  ;;  %1258 = vmatmul.mubr.msk.bf16.gmra.mrb[36].mxu1 %vm246_vm1, %v1307_v23 }
  0x57   :  { %1201 = vmatprep.mubr.msk.bf16.mxu0 %vm1432_vm0, %v1431_v0  ;;  %1261 = vmatprep.mubr.msk.bf16.mxu1 %vm1432_vm0, %v1431_v0 }
  0x5e   :  { %1202 = vmatmul.mubr.msk.bf16.gmra.mrb[40].mxu0 %vm246_vm1, %v1308_v24  ;;  %1262 = vmatmul.mubr.msk.bf16.gmra.mrb[40].mxu1 %vm246_vm1, %v1309_v25 }
  0x5f   :  { %1205 = vmatprep.mubr.msk.bf16.mxu0 %vm1432_vm0, %v1431_v0  ;;  %1265 = vmatprep.mubr.msk.bf16.mxu1 %vm1432_vm0, %v1431_v0 }
  0x66   :  { %1206 = vmatmul.mubr.msk.bf16.gmra.mrb[44].mxu0 %vm246_vm1, %v1310_v26  ;;  %1266 = vmatmul.mubr.msk.bf16.gmra.mrb[44].mxu1 %vm246_vm1, %v1311_v27 }
  0x67   :  { %1209 = vmatprep.mubr.msk.bf16.mxu0 %vm1432_vm0, %v1431_v0  ;;  %1269 = vmatprep.mubr.msk.bf16.mxu1 %vm1432_vm0, %v1431_v0 }
  0x6e   :  { %1210 = vmatmul.mubr.msk.bf16.gmra.mrb[48].mxu0 %vm246_vm1, %v1312_v28  ;;  %1270 = vmatmul.mubr.msk.bf16.gmra.mrb[48].mxu1 %vm246_vm1, %v1313_v29 }
  0x6f   :  { %1213 = vmatprep.mubr.msk.bf16.mxu0 %vm1432_vm0, %v1431_v0  ;;  %1273 = vmatprep.mubr.msk.bf16.mxu1 %vm1432_vm0, %v1431_v0 }
  0x76   :  { %1214 = vmatmul.mubr.msk.bf16.gmra.mrb[52].mxu0 %vm246_vm1, %v1314_v30  ;;  %1274 = vmatmul.mubr.msk.bf16.gmra.mrb[52].mxu1 %vm246_vm1, %v1315_v31 }
  0x77   :  { %1217 = vmatprep.mubr.msk.bf16.mxu0 %vm1432_vm0, %v1431_v0 }
  0x7e   :  { %1218 = vmatmul.mubr.msk.bf16.gmra.mrb[56].mxu0 %vm246_vm1, %v1316_v32 }
  0xe1   :  { %v368_v34 = vpop.f32.mrb[0].mxu0  ;;  %v488_v35 = vpop.f32.mrb[0].mxu1 }
  0xe2   :  { %v369_v36 = vadd.f32 %v1645_v33, %v368_v34  ;;  %v1163_v37 = vpop.f32.mrb[1].mxu0  ;;  %v489_v38 = vadd.f32 %v1645_v33, %v488_v35  ;;  %v1223_v39 = vpop.f32.mrb[1].mxu1 }
  0xe3   :  { %v371_v40 = vpop.f32.mrb[2].mxu0  ;;  %v491_v41 = vpop.f32.mrb[2].mxu1 }
  0xe4   :  { %1317 = vtanh.f32 %v369_v36  ;;  %v372_v42 = vadd.f32 %v1645_v33, %v371_v40  ;;  %v1164_v43 = vpop.f32.mrb[3].mxu0  ;;  %v492_v44 = vadd.f32 %v1645_v33, %v491_v41  ;;  %v1224_v45 = vpop.f32.mrb[3].mxu1 }
  0xe5   :  { %1319 = vtanh.f32 %v489_v38 }
  0xe6   :  { %1321 = vtanh.f32 %v372_v42 }
  0xe7   :  { %1323 = vtanh.f32 %v492_v44 }
  0xe9   :  { %v376_v46 = vpop.f32.mrb[4].mxu0  ;;  %v496_v47 = vpop.f32.mrb[4].mxu1 }
  0xea   :  { %v377_v48 = vadd.f32 %v1645_v33, %v376_v46  ;;  %v1167_v49 = vpop.f32.mrb[5].mxu0  ;;  %v497_v50 = vadd.f32 %v1645_v33, %v496_v47  ;;  %v1227_v51 = vpop.f32.mrb[5].mxu1 }
  0xeb   :  { %v379_v52 = vpop.f32.mrb[6].mxu0  ;;  %v499_v53 = vpop.f32.mrb[6].mxu1 }
  0xec   :  { %1325 = vtanh.f32 %v377_v48  ;;  %v380_v54 = vadd.f32 %v1645_v33, %v379_v52  ;;  %v1168_v55 = vpop.f32.mrb[7].mxu0  ;;  %v500_v56 = vadd.f32 %v1645_v33, %v499_v53  ;;  %v1228_v57 = vpop.f32.mrb[7].mxu1 }
  0xed   :  { %1327 = vtanh.f32 %v497_v50 }
  0xee   :  { %v1318_v58 = vpop.eup %1317  ;;  %1329 = vtanh.f32 %v380_v54 }
  0xef   :  { %v1320_v59 = vpop.eup %1319  ;;  %v1066_v60 = vpack.c.bf16 %v1318_v58, %v1318_v58  ;;  %1331 = vtanh.f32 %v500_v56 }
  0xf0   :  { %v1322_v61 = vpop.eup %1321  ;;  %v1096_v62 = vpack.c.bf16 %v1320_v59, %v1320_v59 }
  0xf1   :  { %v1324_v63 = vpop.eup %1323  ;;  %885 = vst.msk [vmem:[%s1934_s3] sm:$0xf] %vm884_vm2, %v1066_v60  ;;  %v1067_v0 = vpack.c.bf16 %v1322_v61, %v1322_v61  ;;  %v384_v1 = vpop.f32.mrb[8].mxu0 }
  0xf2   :  { %v504_v2 = vpop.f32.mrb[8].mxu1  ;;  %915 = vst.msk [vmem:[%s1934_s3 + $0x78] sm:$0xf] %vm884_vm2, %v1096_v62  ;;  %v1097_v3 = vpack.c.bf16 %v1324_v63, %v1324_v63  ;;  %v385_v4 = vadd.f32 %v1645_v33, %v384_v1  ;;  %v1171_v5 = vpop.f32.mrb[9].mxu0 }
  0xf3   :  { %v505_v6 = vadd.f32 %v1645_v33, %v504_v2  ;;  %v1231_v7 = vpop.f32.mrb[9].mxu1  ;;  %886 = vst.msk [vmem:[%s1934_s3 + $0x4] sm:$0xf] %vm884_vm2, %v1067_v0  ;;  %v387_v8 = vpop.f32.mrb[10].mxu0 }
  0xf4   :  { %v507_v9 = vpop.f32.mrb[10].mxu1  ;;  %916 = vst.msk [vmem:[%s1934_s3 + $0x7c] sm:$0xf] %vm884_vm2, %v1097_v3  ;;  %1333 = vtanh.f32 %v385_v4  ;;  %v388_v10 = vadd.f32 %v1645_v33, %v387_v8  ;;  %v1172_v11 = vpop.f32.mrb[11].mxu0 }
  0xf5   :  { %v508_v12 = vadd.f32 %v1645_v33, %v507_v9  ;;  %v1232_v13 = vpop.f32.mrb[11].mxu1  ;;  %1335 = vtanh.f32 %v505_v6 }
  0xf6   :  { %v1326_v14 = vpop.eup %1325  ;;  %1337 = vtanh.f32 %v388_v10 }
  0xf7   :  { %v1328_v15 = vpop.eup %1327  ;;  %v1068_v16 = vpack.c.bf16 %v1326_v14, %v1326_v14  ;;  %1339 = vtanh.f32 %v508_v12 }
  0xf8   :  { %v1330_v17 = vpop.eup %1329  ;;  %v1098_v18 = vpack.c.bf16 %v1328_v15, %v1328_v15 }
  0xf9   :  { %v1332_v19 = vpop.eup %1331  ;;  %887 = vst.msk [vmem:[%s1934_s3 + $0x8] sm:$0xf] %vm884_vm2, %v1068_v16  ;;  %v1069_v20 = vpack.c.bf16 %v1330_v17, %v1330_v17  ;;  %v392_v21 = vpop.f32.mrb[12].mxu0 }
  0xfa   :  { %v512_v22 = vpop.f32.mrb[12].mxu1  ;;  %917 = vst.msk [vmem:[%s1934_s3 + $0x80] sm:$0xf] %vm884_vm2, %v1098_v18  ;;  %v1099_v23 = vpack.c.bf16 %v1332_v19, %v1332_v19  ;;  %v393_v24 = vadd.f32 %v1645_v33, %v392_v21  ;;  %v1175_v25 = vpop.f32.mrb[13].mxu0 }
  0xfb   :  { %v513_v26 = vadd.f32 %v1645_v33, %v512_v22  ;;  %v1235_v27 = vpop.f32.mrb[13].mxu1  ;;  %888 = vst.msk [vmem:[%s1934_s3 + $0xc] sm:$0xf] %vm884_vm2, %v1069_v20  ;;  %v395_v28 = vpop.f32.mrb[14].mxu0 }
  0xfc   :  { %v515_v29 = vpop.f32.mrb[14].mxu1  ;;  %918 = vst.msk [vmem:[%s1934_s3 + $0x84] sm:$0xf] %vm884_vm2, %v1099_v23  ;;  %1341 = vtanh.f32 %v393_v24  ;;  %v396_v30 = vadd.f32 %v1645_v33, %v395_v28  ;;  %v1176_v31 = vpop.f32.mrb[15].mxu0 }
  0xfd   :  { %v516_v32 = vadd.f32 %v1645_v33, %v515_v29  ;;  %v1236_v34 = vpop.f32.mrb[15].mxu1  ;;  %1343 = vtanh.f32 %v513_v26 }
  0xfe   :  { %v1334_v35 = vpop.eup %1333  ;;  %1345 = vtanh.f32 %v396_v30 }
  0xff   :  { %v1336_v36 = vpop.eup %1335  ;;  %v1070_v37 = vpack.c.bf16 %v1334_v35, %v1334_v35  ;;  %1347 = vtanh.f32 %v516_v32 }
 0x100   :  { %v1338_v38 = vpop.eup %1337  ;;  %v1100_v39 = vpack.c.bf16 %v1336_v36, %v1336_v36 }
 0x101   :  { %v1340_v40 = vpop.eup %1339  ;;  %889 = vst.msk [vmem:[%s1934_s3 + $0x10] sm:$0xf] %vm884_vm2, %v1070_v37  ;;  %v1071_v41 = vpack.c.bf16 %v1338_v38, %v1338_v38  ;;  %v400_v42 = vpop.f32.mrb[16].mxu0 }
 0x102   :  { %v520_v43 = vpop.f32.mrb[16].mxu1  ;;  %919 = vst.msk [vmem:[%s1934_s3 + $0x88] sm:$0xf] %vm884_vm2, %v1100_v39  ;;  %v1101_v44 = vpack.c.bf16 %v1340_v40, %v1340_v40  ;;  %v401_v45 = vadd.f32 %v1645_v33, %v400_v42  ;;  %v1179_v46 = vpop.f32.mrb[17].mxu0 }
 0x103   :  { %v521_v47 = vadd.f32 %v1645_v33, %v520_v43  ;;  %v1239_v48 = vpop.f32.mrb[17].mxu1  ;;  %890 = vst.msk [vmem:[%s1934_s3 + $0x14] sm:$0xf] %vm884_vm2, %v1071_v41  ;;  %v403_v49 = vpop.f32.mrb[18].mxu0 }
 0x104   :  { %v523_v50 = vpop.f32.mrb[18].mxu1  ;;  %920 = vst.msk [vmem:[%s1934_s3 + $0x8c] sm:$0xf] %vm884_vm2, %v1101_v44  ;;  %1349 = vtanh.f32 %v401_v45  ;;  %v404_v51 = vadd.f32 %v1645_v33, %v403_v49  ;;  %v1180_v52 = vpop.f32.mrb[19].mxu0 }
 0x105   :  { %v524_v53 = vadd.f32 %v1645_v33, %v523_v50  ;;  %v1240_v54 = vpop.f32.mrb[19].mxu1  ;;  %1351 = vtanh.f32 %v521_v47 }
 0x106   :  { %v1342_v55 = vpop.eup %1341  ;;  %1353 = vtanh.f32 %v404_v51 }
 0x107   :  { %v1344_v56 = vpop.eup %1343  ;;  %v1072_v57 = vpack.c.bf16 %v1342_v55, %v1342_v55  ;;  %1355 = vtanh.f32 %v524_v53 }
 0x108   :  { %v1346_v58 = vpop.eup %1345  ;;  %v1102_v59 = vpack.c.bf16 %v1344_v56, %v1344_v56 }
 0x109   :  { %v1348_v60 = vpop.eup %1347  ;;  %891 = vst.msk [vmem:[%s1934_s3 + $0x18] sm:$0xf] %vm884_vm2, %v1072_v57  ;;  %v1073_v61 = vpack.c.bf16 %v1346_v58, %v1346_v58  ;;  %v408_v62 = vpop.f32.mrb[20].mxu0 }
 0x10a   :  { %v528_v63 = vpop.f32.mrb[20].mxu1  ;;  %921 = vst.msk [vmem:[%s1934_s3 + $0x90] sm:$0xf] %vm884_vm2, %v1102_v59  ;;  %v1103_v0 = vpack.c.bf16 %v1348_v60, %v1348_v60  ;;  %v409_v1 = vadd.f32 %v1645_v33, %v408_v62  ;;  %v1183_v2 = vpop.f32.mrb[21].mxu0 }
 0x10b   :  { %v529_v3 = vadd.f32 %v1645_v33, %v528_v63  ;;  %v1243_v4 = vpop.f32.mrb[21].mxu1  ;;  %892 = vst.msk [vmem:[%s1934_s3 + $0x1c] sm:$0xf] %vm884_vm2, %v1073_v61  ;;  %v411_v5 = vpop.f32.mrb[22].mxu0 }
 0x10c   :  { %v531_v6 = vpop.f32.mrb[22].mxu1  ;;  %922 = vst.msk [vmem:[%s1934_s3 + $0x94] sm:$0xf] %vm884_vm2, %v1103_v0  ;;  %1357 = vtanh.f32 %v409_v1  ;;  %v412_v7 = vadd.f32 %v1645_v33, %v411_v5  ;;  %v1184_v8 = vpop.f32.mrb[23].mxu0 }
 0x10d   :  { %v532_v9 = vadd.f32 %v1645_v33, %v531_v6  ;;  %v1244_v10 = vpop.f32.mrb[23].mxu1  ;;  %1359 = vtanh.f32 %v529_v3 }
 0x10e   :  { %v1350_v11 = vpop.eup %1349  ;;  %1361 = vtanh.f32 %v412_v7 }
 0x10f   :  { %v1352_v12 = vpop.eup %1351  ;;  %v1074_v13 = vpack.c.bf16 %v1350_v11, %v1350_v11  ;;  %1363 = vtanh.f32 %v532_v9 }
 0x110   :  { %v1354_v14 = vpop.eup %1353  ;;  %v1104_v15 = vpack.c.bf16 %v1352_v12, %v1352_v12 }
 0x111   :  { %v1356_v16 = vpop.eup %1355  ;;  %893 = vst.msk [vmem:[%s1934_s3 + $0x20] sm:$0xf] %vm884_vm2, %v1074_v13  ;;  %v1075_v17 = vpack.c.bf16 %v1354_v14, %v1354_v14  ;;  %v416_v18 = vpop.f32.mrb[24].mxu0 }
 0x112   :  { %v536_v19 = vpop.f32.mrb[24].mxu1  ;;  %923 = vst.msk [vmem:[%s1934_s3 + $0x98] sm:$0xf] %vm884_vm2, %v1104_v15  ;;  %v1105_v20 = vpack.c.bf16 %v1356_v16, %v1356_v16  ;;  %v417_v21 = vadd.f32 %v1645_v33, %v416_v18  ;;  %v1187_v22 = vpop.f32.mrb[25].mxu0 }
 0x113   :  { %v537_v23 = vadd.f32 %v1645_v33, %v536_v19  ;;  %v1247_v24 = vpop.f32.mrb[25].mxu1  ;;  %894 = vst.msk [vmem:[%s1934_s3 + $0x24] sm:$0xf] %vm884_vm2, %v1075_v17  ;;  %v419_v25 = vpop.f32.mrb[26].mxu0 }
 0x114   :  { %v539_v26 = vpop.f32.mrb[26].mxu1  ;;  %924 = vst.msk [vmem:[%s1934_s3 + $0x9c] sm:$0xf] %vm884_vm2, %v1105_v20  ;;  %1365 = vtanh.f32 %v417_v21  ;;  %v420_v27 = vadd.f32 %v1645_v33, %v419_v25  ;;  %v1188_v28 = vpop.f32.mrb[27].mxu0 }
 0x115   :  { %v540_v29 = vadd.f32 %v1645_v33, %v539_v26  ;;  %v1248_v30 = vpop.f32.mrb[27].mxu1  ;;  %1367 = vtanh.f32 %v537_v23 }
 0x116   :  { %v1358_v31 = vpop.eup %1357  ;;  %1369 = vtanh.f32 %v420_v27 }
 0x117   :  { %v1360_v32 = vpop.eup %1359  ;;  %v1076_v34 = vpack.c.bf16 %v1358_v31, %v1358_v31  ;;  %1371 = vtanh.f32 %v540_v29 }
 0x118   :  { %v1362_v35 = vpop.eup %1361  ;;  %v1106_v36 = vpack.c.bf16 %v1360_v32, %v1360_v32 }
 0x119   :  { %v1364_v37 = vpop.eup %1363  ;;  %895 = vst.msk [vmem:[%s1934_s3 + $0x28] sm:$0xf] %vm884_vm2, %v1076_v34  ;;  %v1077_v38 = vpack.c.bf16 %v1362_v35, %v1362_v35  ;;  %v424_v39 = vpop.f32.mrb[28].mxu0 }
 0x11a   :  { %v544_v40 = vpop.f32.mrb[28].mxu1  ;;  %925 = vst.msk [vmem:[%s1934_s3 + $0xa0] sm:$0xf] %vm884_vm2, %v1106_v36  ;;  %v1107_v41 = vpack.c.bf16 %v1364_v37, %v1364_v37  ;;  %v425_v42 = vadd.f32 %v1645_v33, %v424_v39  ;;  %v1191_v43 = vpop.f32.mrb[29].mxu0 }
 0x11b   :  { %v545_v44 = vadd.f32 %v1645_v33, %v544_v40  ;;  %v1251_v45 = vpop.f32.mrb[29].mxu1  ;;  %896 = vst.msk [vmem:[%s1934_s3 + $0x2c] sm:$0xf] %vm884_vm2, %v1077_v38  ;;  %v427_v46 = vpop.f32.mrb[30].mxu0 }
 0x11c   :  { %v547_v47 = vpop.f32.mrb[30].mxu1  ;;  %926 = vst.msk [vmem:[%s1934_s3 + $0xa4] sm:$0xf] %vm884_vm2, %v1107_v41  ;;  %1373 = vtanh.f32 %v425_v42  ;;  %v428_v48 = vadd.f32 %v1645_v33, %v427_v46  ;;  %v1192_v49 = vpop.f32.mrb[31].mxu0 }
 0x11d   :  { %v548_v50 = vadd.f32 %v1645_v33, %v547_v47  ;;  %v1252_v51 = vpop.f32.mrb[31].mxu1  ;;  %1375 = vtanh.f32 %v545_v44 }
 0x11e   :  { %v1366_v52 = vpop.eup %1365  ;;  %1377 = vtanh.f32 %v428_v48 }
 0x11f   :  { %v1368_v53 = vpop.eup %1367  ;;  %v1078_v54 = vpack.c.bf16 %v1366_v52, %v1366_v52  ;;  %1379 = vtanh.f32 %v548_v50 }
 0x120   :  { %v1370_v55 = vpop.eup %1369  ;;  %v1108_v56 = vpack.c.bf16 %v1368_v53, %v1368_v53 }
 0x121   :  { %v1372_v57 = vpop.eup %1371  ;;  %897 = vst.msk [vmem:[%s1934_s3 + $0x30] sm:$0xf] %vm884_vm2, %v1078_v54  ;;  %v1079_v58 = vpack.c.bf16 %v1370_v55, %v1370_v55  ;;  %v432_v59 = vpop.f32.mrb[32].mxu0 }
 0x122   :  { %v552_v60 = vpop.f32.mrb[32].mxu1  ;;  %927 = vst.msk [vmem:[%s1934_s3 + $0xa8] sm:$0xf] %vm884_vm2, %v1108_v56  ;;  %v1109_v61 = vpack.c.bf16 %v1372_v57, %v1372_v57  ;;  %v433_v62 = vadd.f32 %v1645_v33, %v432_v59  ;;  %v1195_v63 = vpop.f32.mrb[33].mxu0 }
 0x123   :  { %v553_v0 = vadd.f32 %v1645_v33, %v552_v60  ;;  %v1255_v1 = vpop.f32.mrb[33].mxu1  ;;  %898 = vst.msk [vmem:[%s1934_s3 + $0x34] sm:$0xf] %vm884_vm2, %v1079_v58  ;;  %v435_v2 = vpop.f32.mrb[34].mxu0 }
 0x124   :  { %v555_v3 = vpop.f32.mrb[34].mxu1  ;;  %928 = vst.msk [vmem:[%s1934_s3 + $0xac] sm:$0xf] %vm884_vm2, %v1109_v61  ;;  %1381 = vtanh.f32 %v433_v62  ;;  %v436_v4 = vadd.f32 %v1645_v33, %v435_v2  ;;  %v1196_v5 = vpop.f32.mrb[35].mxu0 }
 0x125   :  { %v556_v6 = vadd.f32 %v1645_v33, %v555_v3  ;;  %v1256_v7 = vpop.f32.mrb[35].mxu1  ;;  %1383 = vtanh.f32 %v553_v0 }
 0x126   :  { %v1374_v8 = vpop.eup %1373  ;;  %1385 = vtanh.f32 %v436_v4 }
 0x127   :  { %v1376_v9 = vpop.eup %1375  ;;  %v1080_v10 = vpack.c.bf16 %v1374_v8, %v1374_v8  ;;  %1387 = vtanh.f32 %v556_v6 }
 0x128   :  { %v1378_v11 = vpop.eup %1377  ;;  %v1110_v12 = vpack.c.bf16 %v1376_v9, %v1376_v9 }
 0x129   :  { %v1380_v13 = vpop.eup %1379  ;;  %899 = vst.msk [vmem:[%s1934_s3 + $0x38] sm:$0xf] %vm884_vm2, %v1080_v10  ;;  %v1081_v14 = vpack.c.bf16 %v1378_v11, %v1378_v11  ;;  %v440_v15 = vpop.f32.mrb[36].mxu0 }
 0x12a   :  { %v560_v16 = vpop.f32.mrb[36].mxu1  ;;  %929 = vst.msk [vmem:[%s1934_s3 + $0xb0] sm:$0xf] %vm884_vm2, %v1110_v12  ;;  %v1111_v17 = vpack.c.bf16 %v1380_v13, %v1380_v13  ;;  %v441_v18 = vadd.f32 %v1645_v33, %v440_v15  ;;  %v1199_v19 = vpop.f32.mrb[37].mxu0 }
 0x12b   :  { %v561_v20 = vadd.f32 %v1645_v33, %v560_v16  ;;  %v1259_v21 = vpop.f32.mrb[37].mxu1  ;;  %900 = vst.msk [vmem:[%s1934_s3 + $0x3c] sm:$0xf] %vm884_vm2, %v1081_v14  ;;  %v443_v22 = vpop.f32.mrb[38].mxu0 }
 0x12c   :  { %v563_v23 = vpop.f32.mrb[38].mxu1  ;;  %930 = vst.msk [vmem:[%s1934_s3 + $0xb4] sm:$0xf] %vm884_vm2, %v1111_v17  ;;  %1389 = vtanh.f32 %v441_v18  ;;  %v444_v24 = vadd.f32 %v1645_v33, %v443_v22  ;;  %v1200_v25 = vpop.f32.mrb[39].mxu0 }
 0x12d   :  { %v564_v26 = vadd.f32 %v1645_v33, %v563_v23  ;;  %v1260_v27 = vpop.f32.mrb[39].mxu1  ;;  %1391 = vtanh.f32 %v561_v20 }
 0x12e   :  { %v1382_v28 = vpop.eup %1381  ;;  %1393 = vtanh.f32 %v444_v24 }
 0x12f   :  { %v1384_v29 = vpop.eup %1383  ;;  %v1082_v30 = vpack.c.bf16 %v1382_v28, %v1382_v28  ;;  %1395 = vtanh.f32 %v564_v26 }
 0x130   :  { %v1386_v31 = vpop.eup %1385  ;;  %v1112_v32 = vpack.c.bf16 %v1384_v29, %v1384_v29 }
 0x131   :  { %v1388_v34 = vpop.eup %1387  ;;  %901 = vst.msk [vmem:[%s1934_s3 + $0x40] sm:$0xf] %vm884_vm2, %v1082_v30  ;;  %v1083_v35 = vpack.c.bf16 %v1386_v31, %v1386_v31  ;;  %v448_v36 = vpop.f32.mrb[40].mxu0 }
 0x132   :  { %v568_v37 = vpop.f32.mrb[40].mxu1  ;;  %931 = vst.msk [vmem:[%s1934_s3 + $0xb8] sm:$0xf] %vm884_vm2, %v1112_v32  ;;  %v1113_v38 = vpack.c.bf16 %v1388_v34, %v1388_v34  ;;  %v449_v39 = vadd.f32 %v1645_v33, %v448_v36  ;;  %v1203_v40 = vpop.f32.mrb[41].mxu0 }
 0x133   :  { %v569_v41 = vadd.f32 %v1645_v33, %v568_v37  ;;  %v1263_v42 = vpop.f32.mrb[41].mxu1  ;;  %902 = vst.msk [vmem:[%s1934_s3 + $0x44] sm:$0xf] %vm884_vm2, %v1083_v35  ;;  %v451_v43 = vpop.f32.mrb[42].mxu0 }
 0x134   :  { %v571_v44 = vpop.f32.mrb[42].mxu1  ;;  %932 = vst.msk [vmem:[%s1934_s3 + $0xbc] sm:$0xf] %vm884_vm2, %v1113_v38  ;;  %1397 = vtanh.f32 %v449_v39  ;;  %v452_v45 = vadd.f32 %v1645_v33, %v451_v43  ;;  %v1204_v46 = vpop.f32.mrb[43].mxu0 }
 0x135   :  { %v572_v47 = vadd.f32 %v1645_v33, %v571_v44  ;;  %v1264_v48 = vpop.f32.mrb[43].mxu1  ;;  %1399 = vtanh.f32 %v569_v41 }
 0x136   :  { %v1390_v49 = vpop.eup %1389  ;;  %1401 = vtanh.f32 %v452_v45 }
 0x137   :  { %v1392_v50 = vpop.eup %1391  ;;  %v1084_v51 = vpack.c.bf16 %v1390_v49, %v1390_v49  ;;  %1403 = vtanh.f32 %v572_v47 }
 0x138   :  { %v1394_v52 = vpop.eup %1393  ;;  %v1114_v53 = vpack.c.bf16 %v1392_v50, %v1392_v50 }
 0x139   :  { %v1396_v54 = vpop.eup %1395  ;;  %903 = vst.msk [vmem:[%s1934_s3 + $0x48] sm:$0xf] %vm884_vm2, %v1084_v51  ;;  %v1085_v55 = vpack.c.bf16 %v1394_v52, %v1394_v52  ;;  %v456_v56 = vpop.f32.mrb[44].mxu0 }
 0x13a   :  { %v576_v57 = vpop.f32.mrb[44].mxu1  ;;  %933 = vst.msk [vmem:[%s1934_s3 + $0xc0] sm:$0xf] %vm884_vm2, %v1114_v53  ;;  %v1115_v58 = vpack.c.bf16 %v1396_v54, %v1396_v54  ;;  %v457_v59 = vadd.f32 %v1645_v33, %v456_v56  ;;  %v1207_v60 = vpop.f32.mrb[45].mxu0 }
 0x13b   :  { %v577_v61 = vadd.f32 %v1645_v33, %v576_v57  ;;  %v1267_v62 = vpop.f32.mrb[45].mxu1  ;;  %904 = vst.msk [vmem:[%s1934_s3 + $0x4c] sm:$0xf] %vm884_vm2, %v1085_v55  ;;  %v459_v63 = vpop.f32.mrb[46].mxu0 }
 0x13c   :  { %v579_v0 = vpop.f32.mrb[46].mxu1  ;;  %934 = vst.msk [vmem:[%s1934_s3 + $0xc4] sm:$0xf] %vm884_vm2, %v1115_v58  ;;  %1405 = vtanh.f32 %v457_v59  ;;  %v460_v1 = vadd.f32 %v1645_v33, %v459_v63  ;;  %v1208_v2 = vpop.f32.mrb[47].mxu0 }
 0x13d   :  { %v580_v3 = vadd.f32 %v1645_v33, %v579_v0  ;;  %v1268_v4 = vpop.f32.mrb[47].mxu1  ;;  %1407 = vtanh.f32 %v577_v61 }
 0x13e   :  { %v1398_v5 = vpop.eup %1397  ;;  %1409 = vtanh.f32 %v460_v1 }
 0x13f   :  { %v1400_v6 = vpop.eup %1399  ;;  %v1086_v7 = vpack.c.bf16 %v1398_v5, %v1398_v5  ;;  %1411 = vtanh.f32 %v580_v3 }
 0x140   :  { %v1402_v8 = vpop.eup %1401  ;;  %v1116_v9 = vpack.c.bf16 %v1400_v6, %v1400_v6 }
 0x141   :  { %v1404_v10 = vpop.eup %1403  ;;  %905 = vst.msk [vmem:[%s1934_s3 + $0x50] sm:$0xf] %vm884_vm2, %v1086_v7  ;;  %v1087_v11 = vpack.c.bf16 %v1402_v8, %v1402_v8  ;;  %v464_v12 = vpop.f32.mrb[48].mxu0 }
 0x142   :  { %v584_v13 = vpop.f32.mrb[48].mxu1  ;;  %935 = vst.msk [vmem:[%s1934_s3 + $0xc8] sm:$0xf] %vm884_vm2, %v1116_v9  ;;  %v1117_v14 = vpack.c.bf16 %v1404_v10, %v1404_v10  ;;  %v465_v15 = vadd.f32 %v1645_v33, %v464_v12  ;;  %v1211_v16 = vpop.f32.mrb[49].mxu0 }
 0x143   :  { %v585_v17 = vadd.f32 %v1645_v33, %v584_v13  ;;  %v1271_v18 = vpop.f32.mrb[49].mxu1  ;;  %906 = vst.msk [vmem:[%s1934_s3 + $0x54] sm:$0xf] %vm884_vm2, %v1087_v11  ;;  %v467_v19 = vpop.f32.mrb[50].mxu0 }
 0x144   :  { %v587_v20 = vpop.f32.mrb[50].mxu1  ;;  %936 = vst.msk [vmem:[%s1934_s3 + $0xcc] sm:$0xf] %vm884_vm2, %v1117_v14  ;;  %1413 = vtanh.f32 %v465_v15  ;;  %v468_v21 = vadd.f32 %v1645_v33, %v467_v19  ;;  %v1212_v22 = vpop.f32.mrb[51].mxu0 }
 0x145   :  { %v588_v23 = vadd.f32 %v1645_v33, %v587_v20  ;;  %v1272_v24 = vpop.f32.mrb[51].mxu1  ;;  %1415 = vtanh.f32 %v585_v17 }
 0x146   :  { %v1406_v25 = vpop.eup %1405  ;;  %1417 = vtanh.f32 %v468_v21 }
 0x147   :  { %v1408_v26 = vpop.eup %1407  ;;  %v1088_v27 = vpack.c.bf16 %v1406_v25, %v1406_v25  ;;  %1419 = vtanh.f32 %v588_v23 }
 0x148   :  { %v1410_v28 = vpop.eup %1409  ;;  %v1118_v29 = vpack.c.bf16 %v1408_v26, %v1408_v26 }
 0x149   :  { %v1412_v30 = vpop.eup %1411  ;;  %907 = vst.msk [vmem:[%s1934_s3 + $0x58] sm:$0xf] %vm884_vm2, %v1088_v27  ;;  %v1089_v31 = vpack.c.bf16 %v1410_v28, %v1410_v28  ;;  %v472_v32 = vpop.f32.mrb[52].mxu0 }
 0x14a   :  { %v592_v34 = vpop.f32.mrb[52].mxu1  ;;  %937 = vst.msk [vmem:[%s1934_s3 + $0xd0] sm:$0xf] %vm884_vm2, %v1118_v29  ;;  %v1119_v35 = vpack.c.bf16 %v1412_v30, %v1412_v30  ;;  %v473_v36 = vadd.f32 %v1645_v33, %v472_v32  ;;  %v1215_v37 = vpop.f32.mrb[53].mxu0 }
 0x14b   :  { %v593_v38 = vadd.f32 %v1645_v33, %v592_v34  ;;  %v1275_v39 = vpop.f32.mrb[53].mxu1  ;;  %908 = vst.msk [vmem:[%s1934_s3 + $0x5c] sm:$0xf] %vm884_vm2, %v1089_v31  ;;  %v475_v40 = vpop.f32.mrb[54].mxu0 }
 0x14c   :  { %v595_v41 = vpop.f32.mrb[54].mxu1  ;;  %938 = vst.msk [vmem:[%s1934_s3 + $0xd4] sm:$0xf] %vm884_vm2, %v1119_v35  ;;  %1421 = vtanh.f32 %v473_v36  ;;  %v476_v42 = vadd.f32 %v1645_v33, %v475_v40  ;;  %v1216_v43 = vpop.f32.mrb[55].mxu0 }
 0x14d   :  { %v1276_v44 = vpop.f32.mrb[55].mxu1  ;;  %1423 = vtanh.f32 %v593_v38 }
 0x14e   :  { %v1414_v45 = vpop.eup %1413  ;;  %1425 = vtanh.f32 %v476_v42 }
 0x14f   :  { %v1416_v46 = vpop.eup %1415  ;;  %v1090_v47 = vpack.c.bf16 %v1414_v45, %v1414_v45 }
 0x150   :  { %v1418_v48 = vpop.eup %1417  ;;  %v1120_v49 = vpack.c.bf16 %v1416_v46, %v1416_v46 }
 0x151   :  { %v1420_v50 = vpop.eup %1419  ;;  %909 = vst.msk [vmem:[%s1934_s3 + $0x60] sm:$0xf] %vm884_vm2, %v1090_v47  ;;  %v1091_v51 = vpack.c.bf16 %v1418_v48, %v1418_v48  ;;  %v480_v52 = vpop.f32.mrb[56].mxu0 }
 0x152   :  { %939 = vst.msk [vmem:[%s1934_s3 + $0xd8] sm:$0xf] %vm884_vm2, %v1120_v49  ;;  %v1121_v53 = vpack.c.bf16 %v1420_v50, %v1420_v50  ;;  %v481_v54 = vadd.f32 %v1645_v33, %v480_v52  ;;  %v1219_v55 = vpop.f32.mrb[57].mxu0 }
 0x153   :  { %910 = vst.msk [vmem:[%s1934_s3 + $0x64] sm:$0xf] %vm884_vm2, %v1091_v51  ;;  %v483_v56 = vpop.f32.mrb[58].mxu0 }
 0x154   :  { %940 = vst.msk [vmem:[%s1934_s3 + $0xdc] sm:$0xf] %vm884_vm2, %v1121_v53  ;;  %1427 = vtanh.f32 %v481_v54  ;;  %v484_v57 = vadd.f32 %v1645_v33, %v483_v56  ;;  %v1220_v58 = vpop.f32.mrb[59].mxu0 }
 0x156   :  { %v1422_v59 = vpop.eup %1421  ;;  %1429 = vtanh.f32 %v484_v57 }
 0x157   :  { %v1424_v60 = vpop.eup %1423  ;;  %v1092_v61 = vpack.c.bf16 %v1422_v59, %v1422_v59 }
 0x158   :  { %v1426_v62 = vpop.eup %1425  ;;  %v1122_v63 = vpack.c.bf16 %v1424_v60, %v1424_v60 }
 0x159   :  { %911 = vst.msk [vmem:[%s1934_s3 + $0x68] sm:$0xf] %vm884_vm2, %v1092_v61  ;;  %v1093_v0 = vpack.c.bf16 %v1426_v62, %v1426_v62 }
 0x15a   :  { %942 = vst.msk [vmem:[%s1934_s3 + $0xe0] sm:$0x1] %vm941_vm3, %v1122_v63 }
 0x15b   :  { %912 = vst.msk [vmem:[%s1934_s3 + $0x6c] sm:$0xf] %vm884_vm2, %v1093_v0 }
 0x15e   :  { %v1428_v33 = vpop.eup %1427 }
 0x15f   :  { %v1094_v1 = vpack.c.bf16 %v1428_v33, %v1428_v33 }
 0x160   :  { %v1430_v2 = vpop.eup %1429 }
 0x161   :  { %913 = vst.msk [vmem:[%s1934_s3 + $0x70] sm:$0xf] %vm884_vm2, %v1094_v1  ;;  %v1095_v3 = vpack.c.bf16 %v1430_v2, %v1430_v2 }
 0x163   :  { %914 = vst.msk [vmem:[%s1934_s3 + $0x74] sm:$0xf] %vm884_vm2, %v1095_v3 }

// kernel: cnn_forward.4
= control target key start
LH: loop header
LB: loop body
LE: loop exit
PB: predicated region body
PF: predicated region fallthrough
CT: control target
= control target key end

     0   :  { %vm284_vm0 = vcmask 261120   ;;  %vm440_vm1 = vcmask 257024   ;;  %s781_s1 = inlined_call_operand.vmem [shape: bf16[256,32], index: 1, kind: input, shape index: {}]   ;;  %s782_s0 = inlined_call_operand.vmem [shape: bf16[72,256], index: 0, kind: input, shape index: {}]   ;;  %s783_s2 = inlined_call_operand.vmem [shape: f32[1,32], index: 2, kind: input, shape index: {}]   ;;  %s784_s3 = inlined_call_operand.vmem [shape: f32[1,32], index: 3, kind: input, shape index: {}]   ;;  %s785_s4 = inlined_call_operand.vmem [shape: f32[1,32], index: 4, kind: input, shape index: {}]   ;;  %s786_s5 = inlined_call_operand.vmem [shape: bf16[72,32], index: 5, kind: output, shape index: {}]  }
   0x1   :  { %v563_v0 = vld [vmem:[%s781_s1 + $0x40] sm:$0xff]   ;;  %v565_v2 = vld [vmem:[%s781_s1 + $0x48] sm:$0xff]   ;;  %v567_v4 = vld [vmem:[%s781_s1 + $0x50] sm:$0xff]  }
   0x2   :  { %v564_v1 = vld [vmem:[%s781_s1] sm:$0xff]   ;;  %501 = vmatprep.subr.bf16.mxu0 %v563_v0  ;;  %547 = vmatprep.subr.bf16.mxu1 %v563_v0  ;;  %v566_v3 = vld [vmem:[%s781_s1 + $0x8] sm:$0xff]   ;;  %v568_v5 = vld [vmem:[%s781_s1 + $0x10] sm:$0xff]  }
   0x3   :  { %502 = vmatpush3.bf16.msra.mxu0 %v564_v1  ;;  %555 = vmatpush3.bf16.msra.mxu1 %v564_v1  ;;  %v569_v6 = vld [vmem:[%s781_s1 + $0x58] sm:$0xff]   ;;  %v571_v8 = vld [vmem:[%s781_s1 + $0x60] sm:$0xff]   ;;  %v573_v10 = vld [vmem:[%s781_s1 + $0x68] sm:$0xff]  }
   0x4   :  { %503 = vmatprep.subr.bf16.mxu0 %v565_v2  ;;  %548 = vmatprep.subr.bf16.mxu1 %v565_v2  ;;  %v570_v7 = vld [vmem:[%s781_s1 + $0x18] sm:$0xff]   ;;  %v572_v9 = vld [vmem:[%s781_s1 + $0x20] sm:$0xff]   ;;  %v574_v12 = vld [vmem:[%s781_s1 + $0x28] sm:$0xff]  }
   0x5   :  { %v581_v11 = vld [vmem:[%s782_s0 + $0x4] ss:$8 sps:$4 sm:$0xff]   ;;  %v587_v13 = vld [vmem:[%s782_s0 + $0x34] ss:$8 sps:$4 sm:$0xff]   ;;  %v579_v19 = vld [vmem:[%s782_s0] ss:$8 sps:$4 sm:$0xff]  }
   0x6   :  { %v575_v14 = vld [vmem:[%s781_s1 + $0x70] sm:$0xff]   ;;  %244 = vmatprep.mubr.bf16.mxu0 %v581_v11  ;;  %268 = vmatprep.mubr.bf16.mxu1 %v587_v13  ;;  %v577_v16 = vld [vmem:[%s781_s1 + $0x78] sm:$0xff]   ;;  %v29_v18 = vld [vmem:[%s782_s0 + $0x40] sm:$0xff] }
   0x7   :  { %504 = vmatpush3.bf16.msra.mxu0 %v566_v3  ;;  %556 = vmatpush3.bf16.msra.mxu1 %v566_v3  ;;  %v576_v15 = vld [vmem:[%s781_s1 + $0x30] sm:$0xff]   ;;  %v578_v17 = vld [vmem:[%s781_s1 + $0x38] sm:$0xff]   ;;  %v464_v22 = vcombine.high %v29_v18, %v29_v18  ;;  %v463_v24 = vcombine.low %v29_v18, %v29_v18  ;;  %v588_v25 = vld [vmem:[%s782_s0 + $0x24] ss:$8 sps:$4 sm:$0xff]  }
   0x8   :  { %505 = vmatprep.subr.bf16.mxu0 %v567_v4  ;;  %549 = vmatprep.subr.bf16.mxu1 %v567_v4  ;;  %v585_v20 = vld [vmem:[%s782_s0 + $0x30] ss:$8 sps:$4 sm:$0xff]   ;;  %v582_v21 = vld [vmem:[%s782_s0 + $0x14] ss:$8 sps:$4 sm:$0xff]   ;;  %v590_v26 = vld [vmem:[%s782_s0 + $0x20] ss:$8 sps:$4 sm:$0xff]  }
   0x9   :  { %v584_v23 = vld [vmem:[%s782_s0 + $0x10] ss:$8 sps:$4 sm:$0xff]   ;;  %v454_v29 = vld [vmem:[%s783_s2] ss:$0 sm:$0xff] }
   0xb   :  { %506 = vmatpush3.bf16.msra.mxu0 %v568_v5  ;;  %557 = vmatpush3.bf16.msra.mxu1 %v568_v5 }
   0xc   :  { %507 = vmatprep.subr.bf16.mxu0 %v569_v6  ;;  %550 = vmatprep.subr.bf16.mxu1 %v569_v6 }
   0xf   :  { %508 = vmatpush3.bf16.msra.mxu0 %v570_v7  ;;  %558 = vmatpush3.bf16.msra.mxu1 %v570_v7 }
  0x10   :  { %509 = vmatprep.subr.bf16.mxu0 %v571_v8  ;;  %551 = vmatprep.subr.bf16.mxu1 %v571_v8 }
  0x13   :  { %510 = vmatpush3.bf16.msra.mxu0 %v572_v9  ;;  %559 = vmatpush3.bf16.msra.mxu1 %v572_v9 }
  0x14   :  { %511 = vmatprep.subr.bf16.mxu0 %v573_v10  ;;  %552 = vmatprep.subr.bf16.mxu1 %v573_v10 }
  0x17   :  { %512 = vmatpush3.bf16.msra.mxu0 %v574_v12  ;;  %560 = vmatpush3.bf16.msra.mxu1 %v574_v12 }
  0x18   :  { %513 = vmatprep.subr.bf16.mxu0 %v575_v14  ;;  %553 = vmatprep.subr.bf16.mxu1 %v575_v14 }
  0x1b   :  { %514 = vmatpush3.bf16.msra.mxu0 %v576_v15  ;;  %561 = vmatpush3.bf16.msra.mxu1 %v576_v15 }
  0x1c   :  { %515 = vmatprep.subr.bf16.mxu0 %v577_v16  ;;  %554 = vmatprep.subr.bf16.mxu1 %v577_v16 }
  0x1f   :  { %516 = vmatpush3.bf16.msra.mxu0 %v578_v17  ;;  %562 = vmatpush3.bf16.msra.mxu1 %v578_v17 }
  0x22   :  { %245 = vmatmul.mubr.bf16.vlgmr.msra.gmra.mrb[0].mxu0 %v579_v19  ;;  %269 = vmatmul.mubr.bf16.vlgmr.msra.gmra.mrb[0].mxu1 %v585_v20 }
  0x23   :  { %252 = vmatprep.mubr.bf16.mxu0 %v582_v21  ;;  %276 = vmatprep.mubr.bf16.mxu1 %v464_v22 }
  0x2a   :  { %253 = vmatmul.mubr.bf16.gmra.mrb[4].mxu0 %v584_v23  ;;  %277 = vmatmul.mubr.bf16.gmra.mrb[4].mxu1 %v463_v24 }
  0x2b   :  { %260 = vmatprep.mubr.bf16.mxu0 %v588_v25 }
  0x32   :  { %261 = vmatmul.mubr.bf16.gmra.mrb[8].mxu0 %v590_v26 }
  0xf5   :  { %v517_v27 = vpop.f32.mrb[0].mxu0  ;;  %v535_v28 = vpop.f32.mrb[0].mxu1 }
  0xf6   :  { %v518_v30 = vpop.f32.mrb[1].mxu0  ;;  %v536_v31 = vpop.f32.mrb[1].mxu1 }
  0xf7   :  { %v519_v32 = vadd.f32 %v518_v30, %v517_v27  ;;  %v520_v33 = vpop.f32.mrb[2].mxu0  ;;  %v537_v34 = vadd.f32 %v536_v31, %v535_v28  ;;  %v538_v35 = vpop.f32.mrb[2].mxu1 }
  0xf8   :  { %v521_v36 = vpop.f32.mrb[3].mxu0  ;;  %v539_v37 = vpop.f32.mrb[3].mxu1 }
  0xf9   :  { %v247_v38 = vadd.f32 %v519_v32, %v454_v29  ;;  %v522_v39 = vadd.f32 %v521_v36, %v520_v33  ;;  %v540_v40 = vadd.f32 %v539_v37, %v538_v35  ;;  %v271_v5 = vadd.f32 %v537_v34, %v454_v29 }
  0xfb   :  { %v250_v41 = vadd.f32 %v522_v39, %v454_v29  ;;  %v285_v42 = vsel %vm284_vm0, %v247_v38, 0.0  ;;  %v274_v9 = vadd.f32 %v540_v40, %v454_v29  ;;  %v296_v13 = vsel %vm284_vm0, %v271_v5, 0.0 }
  0xfd   :  { %v286_v43 = vsel %vm284_vm0, %v250_v41, 0.0  ;;  %v523_v44 = vpop.f32.mrb[4].mxu0  ;;  %v541_v45 = vpop.f32.mrb[4].mxu1  ;;  %v298_v15 = vsel %vm284_vm0, %v274_v9, 0.0 }
  0xfe   :  { %v287_v46 = vadd.f32 %v286_v43, %v285_v42  ;;  %v524_v47 = vpop.f32.mrb[5].mxu0  ;;  %v542_v48 = vpop.f32.mrb[5].mxu1 }
  0xff   :  { %v525_v49 = vadd.f32 %v524_v47, %v523_v44  ;;  %v526_v50 = vpop.f32.mrb[6].mxu0  ;;  %v543_v51 = vadd.f32 %v542_v48, %v541_v45  ;;  %v544_v52 = vpop.f32.mrb[6].mxu1 }
 0x100   :  { %v527_v53 = vpop.f32.mrb[7].mxu0  ;;  %v545_v54 = vpop.f32.mrb[7].mxu1 }
 0x101   :  { %v255_v55 = vadd.f32 %v525_v49, %v454_v29  ;;  %v528_v56 = vadd.f32 %v527_v53, %v526_v50  ;;  %v279_v11 = vadd.f32 %v543_v51, %v454_v29 }
 0x103   :  { %v288_v57 = vsel %vm284_vm0, %v255_v55, 0.0  ;;  %v258_v58 = vadd.f32 %v528_v56, %v454_v29  ;;  %v300_v16 = vsel %vm284_vm0, %v279_v11, 0.0 }
 0x104   :  { %v289_v59 = vadd.f32 %v288_v57, %v287_v46 }
 0x105   :  { %v290_v60 = vsel %vm284_vm0, %v258_v58, 0.0  ;;  %v529_v61 = vpop.f32.mrb[8].mxu0 }
 0x106   :  { %v291_v62 = vadd.f32 %v290_v60, %v289_v59  ;;  %v530_v63 = vpop.f32.mrb[9].mxu0 }
 0x107   :  { %v531_v0 = vadd.f32 %v530_v63, %v529_v61  ;;  %v532_v1 = vpop.f32.mrb[10].mxu0 }
 0x108   :  { %v533_v2 = vpop.f32.mrb[11].mxu0 }
 0x109   :  { %v263_v3 = vadd.f32 %v531_v0, %v454_v29  ;;  %v534_v4 = vadd.f32 %v533_v2, %v532_v1 }
 0x10b   :  { %v292_v6 = vsel %vm284_vm0, %v263_v3, 0.0  ;;  %v266_v7 = vadd.f32 %v534_v4, %v454_v29 }
 0x10c   :  { %v293_v8 = vadd.f32 %v292_v6, %v291_v62  ;;  %v481_v6 = vld [vmem:[%s784_s3] ss:$0 sm:$0xff] }
 0x10d   :  { %v294_v10 = vsel %vm284_vm0, %v266_v7, 0.0 }
 0x10e   :  { %v295_v12 = vadd.f32 %v294_v10, %v293_v8 }
 0x110   :  { %v297_v14 = vadd.f32 %v296_v13, %v295_v12 }
 0x112   :  { %v299_v17 = vadd.f32 %v298_v15, %v297_v14  ;;  %v482_v15 = vld [vmem:[%s785_s4] ss:$0 sm:$0xff] }
 0x114   :  { %v301_v18 = vadd.f32 %v300_v16, %v299_v17 }
 0x116   :  { %v302_v19 = vrot.slane %v301_v18, 4 }
 0x118   :  { %v303_v20 = vadd.f32 %v302_v19, %v301_v18 }
 0x11a   :  { %v304_v21 = vrot.slane %v303_v20, 2 }
 0x11c   :  { %v305_v22 = vadd.f32 %v304_v21, %v303_v20 }
 0x11e   :  { %v306_v23 = vrot.slane %v305_v22, 1 }
 0x120   :  { %v307_v24 = vadd.f32 %v306_v23, %v305_v22 }
 0x122   :  { %v308_v25 = vmul.f32 0.013888889, %v307_v24 }
 0x124   :  { %v309_v26 = vsub.f32 %v247_v38, %v308_v25  ;;  %v310_v27 = vsub.f32 %v250_v41, %v308_v25  ;;  %v311_v28 = vsub.f32 %v255_v55, %v308_v25  ;;  %v312_v29 = vsub.f32 %v258_v58, %v308_v25 }
 0x125   :  { %v313_v30 = vsub.f32 %v263_v3, %v308_v25  ;;  %v314_v31 = vsub.f32 %v266_v7, %v308_v25  ;;  %v315_v32 = vsub.f32 %v271_v5, %v308_v25  ;;  %v316_v33 = vsub.f32 %v274_v9, %v308_v25 }
 0x126   :  { %v317_v34 = vsub.f32 %v279_v11, %v308_v25  ;;  %v318_v35 = vmul.f32 %v309_v26, %v309_v26  ;;  %v319_v36 = vmul.f32 %v310_v27, %v310_v27  ;;  %v320_v37 = vmul.f32 %v311_v28, %v311_v28 }
 0x127   :  { %v321_v39 = vmul.f32 %v312_v29, %v312_v29  ;;  %v322_v44 = vmul.f32 %v313_v30, %v313_v30  ;;  %v323_v45 = vmul.f32 %v314_v31, %v314_v31  ;;  %v324_v48 = vmul.f32 %v315_v32, %v315_v32 }
 0x128   :  { %v327_v40 = vsel %vm284_vm0, %v318_v35, 0.0  ;;  %v328_v42 = vsel %vm284_vm0, %v319_v36, 0.0  ;;  %v330_v38 = vsel %vm284_vm0, %v320_v37, 0.0  ;;  %v325_v51 = vmul.f32 %v316_v33, %v316_v33 }
 0x129   :  { %v329_v43 = vadd.f32 %v328_v42, %v327_v40  ;;  %v332_v46 = vsel %vm284_vm0, %v321_v39, 0.0  ;;  %v334_v49 = vsel %vm284_vm0, %v322_v44, 0.0  ;;  %v336_v52 = vsel %vm284_vm0, %v323_v45, 0.0 }
 0x12a   :  { %v326_v54 = vmul.f32 %v317_v34, %v317_v34  ;;  %v338_v55 = vsel %vm284_vm0, %v324_v48, 0.0  ;;  %v340_v57 = vsel %vm284_vm0, %v325_v51, 0.0 }
 0x12b   :  { %v331_v41 = vadd.f32 %v330_v38, %v329_v43 }
 0x12c   :  { %v342_v59 = vsel %vm284_vm0, %v326_v54, 0.0 }
 0x12d   :  { %v333_v47 = vadd.f32 %v332_v46, %v331_v41 }
 0x12f   :  { %v335_v50 = vadd.f32 %v334_v49, %v333_v47 }
 0x131   :  { %v337_v53 = vadd.f32 %v336_v52, %v335_v50 }
 0x133   :  { %v339_v56 = vadd.f32 %v338_v55, %v337_v53 }
 0x135   :  { %v341_v58 = vadd.f32 %v340_v57, %v339_v56 }
 0x137   :  { %v343_v60 = vadd.f32 %v342_v59, %v341_v58 }
 0x139   :  { %v344_v61 = vrot.slane %v343_v60, 4 }
 0x13b   :  { %v345_v62 = vadd.f32 %v344_v61, %v343_v60 }
 0x13d   :  { %v346_v63 = vrot.slane %v345_v62, 2 }
 0x13f   :  { %v347_v0 = vadd.f32 %v346_v63, %v345_v62 }
 0x141   :  { %v348_v1 = vrot.slane %v347_v0, 1 }
 0x143   :  { %v349_v2 = vadd.f32 %v348_v1, %v347_v0 }
 0x145   :  { %v350_v3 = vmul.f32 0.013888889, %v349_v2 }
 0x147   :  { %v351_v4 = vadd.f32 1e-05, %v350_v3 }
 0x149   :  { %593 = vrsqrt.f32 %v351_v4 }
 0x153   :  { %v594_v5 = vpop.eup %593 }
 0x154   :  { %v353_v7 = vmul.f32 %v594_v5, %v309_v26  ;;  %v354_v8 = vmul.f32 %v594_v5, %v310_v27  ;;  %v355_v9 = vmul.f32 %v594_v5, %v311_v28  ;;  %v356_v10 = vmul.f32 %v594_v5, %v312_v29 }
 0x155   :  { %v357_v11 = vmul.f32 %v594_v5, %v313_v30  ;;  %v358_v12 = vmul.f32 %v594_v5, %v314_v31  ;;  %v359_v13 = vmul.f32 %v594_v5, %v315_v32  ;;  %v360_v14 = vmul.f32 %v594_v5, %v316_v33 }
 0x156   :  { %v361_v16 = vmul.f32 %v594_v5, %v317_v34  ;;  %v369_v17 = vmul.f32 %v481_v6, %v353_v7  ;;  %v370_v18 = vmul.f32 %v481_v6, %v354_v8  ;;  %v371_v19 = vmul.f32 %v481_v6, %v355_v9 }
 0x157   :  { %v372_v20 = vmul.f32 %v481_v6, %v356_v10  ;;  %v373_v21 = vmul.f32 %v481_v6, %v357_v11  ;;  %v374_v22 = vmul.f32 %v481_v6, %v358_v12  ;;  %v375_v23 = vmul.f32 %v481_v6, %v359_v13 }
 0x158   :  { %v385_v24 = vadd.f32 %v482_v15, %v369_v17  ;;  %v386_v25 = vadd.f32 %v482_v15, %v370_v18  ;;  %v376_v26 = vmul.f32 %v481_v6, %v360_v14  ;;  %v387_v27 = vadd.f32 %v482_v15, %v371_v19 }
 0x159   :  { %v388_v28 = vadd.f32 %v482_v15, %v372_v20  ;;  %v377_v29 = vmul.f32 %v481_v6, %v361_v16  ;;  %v389_v30 = vadd.f32 %v482_v15, %v373_v21  ;;  %v390_v31 = vadd.f32 %v482_v15, %v374_v22 }
 0x15a   :  { %595 = vtanh.f32 %v385_v24  ;;  %v391_v32 = vadd.f32 %v482_v15, %v375_v23  ;;  %v392_v33 = vadd.f32 %v482_v15, %v376_v26 }
 0x15b   :  { %597 = vtanh.f32 %v386_v25  ;;  %v393_v34 = vadd.f32 %v482_v15, %v377_v29 }
 0x15c   :  { %599 = vtanh.f32 %v387_v27 }
 0x15d   :  { %601 = vtanh.f32 %v388_v28 }
 0x15e   :  { %603 = vtanh.f32 %v389_v30 }
 0x15f   :  { %605 = vtanh.f32 %v390_v31 }
 0x160   :  { %607 = vtanh.f32 %v391_v32 }
 0x161   :  { %609 = vtanh.f32 %v392_v33 }
 0x162   :  { %611 = vtanh.f32 %v393_v34 }
 0x164   :  { %v596_v35 = vpop.eup %595 }
 0x165   :  { %v598_v36 = vpop.eup %597  ;;  %v492_v37 = vpack.c.bf16 %v596_v35, %v596_v35 }
 0x166   :  { %v600_v39 = vpop.eup %599  ;;  %v493_v40 = vpack.c.bf16 %v598_v36, %v598_v36 }
 0x167   :  { %v602_v42 = vpop.eup %601  ;;  %v494_v43 = vpack.c.bf16 %v600_v39, %v600_v39  ;;  %441 = vst.msk [vmem:[%s786_s5] sm:$0xf] %vm440_vm1, %v492_v37 }
 0x168   :  { %v604_v44 = vpop.eup %603  ;;  %v495_v38 = vpack.c.bf16 %v602_v42, %v602_v42  ;;  %442 = vst.msk [vmem:[%s786_s5 + $0x4] sm:$0xf] %vm440_vm1, %v493_v40 }
 0x169   :  { %v606_v41 = vpop.eup %605  ;;  %v496_v45 = vpack.c.bf16 %v604_v44, %v604_v44  ;;  %443 = vst.msk [vmem:[%s786_s5 + $0x8] sm:$0xf] %vm440_vm1, %v494_v43 }
 0x16a   :  { %v608_v46 = vpop.eup %607  ;;  %v497_v47 = vpack.c.bf16 %v606_v41, %v606_v41  ;;  %444 = vst.msk [vmem:[%s786_s5 + $0xc] sm:$0xf] %vm440_vm1, %v495_v38 }
 0x16b   :  { %v610_v48 = vpop.eup %609  ;;  %v498_v49 = vpack.c.bf16 %v608_v46, %v608_v46  ;;  %445 = vst.msk [vmem:[%s786_s5 + $0x10] sm:$0xf] %vm440_vm1, %v496_v45 }
 0x16c   :  { %v612_v50 = vpop.eup %611  ;;  %v499_v51 = vpack.c.bf16 %v610_v48, %v610_v48  ;;  %446 = vst.msk [vmem:[%s786_s5 + $0x14] sm:$0xf] %vm440_vm1, %v497_v47 }
 0x16d   :  { %v500_v52 = vpack.c.bf16 %v612_v50, %v612_v50  ;;  %447 = vst.msk [vmem:[%s786_s5 + $0x18] sm:$0xf] %vm440_vm1, %v498_v49 }
 0x16e   :  { %448 = vst.msk [vmem:[%s786_s5 + $0x1c] sm:$0xf] %vm440_vm1, %v499_v51 }
 0x16f   :  { %449 = vst.msk [vmem:[%s786_s5 + $0x20] sm:$0xf] %vm440_vm1, %v500_v52 }

// kernel: cnn_forward.5
= control target key start
LH: loop header
LB: loop body
LE: loop exit
PB: predicated region body
PF: predicated region fallthrough
CT: control target
= control target key end

     0   :  { %v118_v28 = vlaneseq  ;;  %v1872_v35 = vmov 1966171168   ;;  %s2483_s0 = inlined_call_operand.vmem [shape: bf16[4,2,512], index: 0, kind: input, shape index: {}]   ;;  %s2484_s1 = inlined_call_operand.vmem [shape: bf16[512,64], index: 1, kind: input, shape index: {}]   ;;  %s2485_s2 = inlined_call_operand.vmem [shape: f32[1,64], index: 2, kind: input, shape index: {}]   ;;  %s2486_s3 = inlined_call_operand.vmem [shape: f32[4,64,128], index: 3, kind: input, shape index: {}]   ;;  %s2487_s4 = inlined_call_operand.vmem [shape: f32[1,128], index: 4, kind: input, shape index: {}]   ;;  %s2488_s5 = inlined_call_operand.vmem [shape: f32[128,64], index: 5, kind: input, shape index: {}]   ;;  %s2489_s6 = inlined_call_operand.vmem [shape: f32[1,64], index: 6, kind: input, shape index: {}]   ;;  %s2490_s7 = inlined_call_operand.vmem [shape: f32[64,10], index: 7, kind: input, shape index: {}]   ;;  %s2491_s8 = inlined_call_operand.vmem [shape: f32[1,10], index: 8, kind: input, shape index: {}]   ;;  %s2492_s9 = inlined_call_operand.hbm [shape: f32[2,10], index: 9, kind: output, shape index: {}]  }
   0x1   :  { %v1930_v0 = vld [vmem:[%s2484_s1 + $0x40] sm:$0xff]   ;;  %v1953_v4 = vld [vmem:[%s2484_s1 + $0x48] sm:$0xff]   ;;  %v1977_v8 = vld [vmem:[%s2484_s1 + $0x50] sm:$0xff]   ;;  %v116_v36 = vunpack.c.l.s4 %v1872_v35 }
   0x2   :  { %v1935_v1 = vld [vmem:[%s2484_s1 + $0xc0] sm:$0xff]   ;;  %1351 = vmatprep.subr.bf16.mxu0 %v1930_v0  ;;  %v1959_v5 = vld [vmem:[%s2484_s1 + $0xc8] sm:$0xff]   ;;  %v1983_v9 = vld [vmem:[%s2484_s1 + $0xd0] sm:$0xff]   ;;  %v119_v33 = vshrl.u32 %v118_v28, 7 }
   0x3   :  { %v1941_v2 = vld [vmem:[%s2484_s1] sm:$0xff]   ;;  %1373 = vmatprep.subr.bf16.mxu1 %v1935_v1  ;;  %v1965_v6 = vld [vmem:[%s2484_s1 + $0x8] sm:$0xff]   ;;  %v1989_v10 = vld [vmem:[%s2484_s1 + $0x10] sm:$0xff]  }
   0x4   :  { %v1947_v3 = vld [vmem:[%s2484_s1 + $0x80] sm:$0xff]   ;;  %1352 = vmatpush3.bf16.msra.mxu0 %v1941_v2  ;;  %v1971_v7 = vld [vmem:[%s2484_s1 + $0x88] sm:$0xff]   ;;  %v1995_v11 = vld [vmem:[%s2484_s1 + $0x90] sm:$0xff]  }
   0x5   :  { %1374 = vmatpush3.bf16.msra.mxu1 %v1947_v3  ;;  %1353 = vmatprep.subr.bf16.mxu0 %v1953_v4  ;;  %v2001_v12 = vld [vmem:[%s2484_s1 + $0x58] sm:$0xff]   ;;  %v2025_v16 = vld [vmem:[%s2484_s1 + $0x60] sm:$0xff]   ;;  %v2049_v20 = vld [vmem:[%s2484_s1 + $0x68] sm:$0xff]  }
   0x6   :  { %1375 = vmatprep.subr.bf16.mxu1 %v1959_v5  ;;  %v2007_v13 = vld [vmem:[%s2484_s1 + $0xd8] sm:$0xff]   ;;  %v2031_v17 = vld [vmem:[%s2484_s1 + $0xe0] sm:$0xff]   ;;  %v2055_v21 = vld [vmem:[%s2484_s1 + $0xe8] sm:$0xff]  }
   0x7   :  { %v2013_v14 = vld [vmem:[%s2484_s1 + $0x18] sm:$0xff]   ;;  %v2037_v18 = vld [vmem:[%s2484_s1 + $0x20] sm:$0xff]   ;;  %v2061_v22 = vld [vmem:[%s2484_s1 + $0x28] sm:$0xff]  }
   0x8   :  { %1354 = vmatpush3.bf16.msra.mxu0 %v1965_v6  ;;  %v2019_v15 = vld [vmem:[%s2484_s1 + $0x98] sm:$0xff]   ;;  %v2043_v19 = vld [vmem:[%s2484_s1 + $0xa0] sm:$0xff]   ;;  %v2067_v23 = vld [vmem:[%s2484_s1 + $0xa8] sm:$0xff]  }
   0x9   :  { %1376 = vmatpush3.bf16.msra.mxu1 %v1971_v7  ;;  %1355 = vmatprep.subr.bf16.mxu0 %v1977_v8  ;;  %v2073_v24 = vld [vmem:[%s2484_s1 + $0x70] sm:$0xff]   ;;  %v2097_v29 = vld [vmem:[%s2484_s1 + $0x78] sm:$0xff]   ;;  %v1280_v34 = vld.sshfl [vmem:[%s2483_s0] sm:$0x33 pattern:$0x75316420] }
   0xa   :  { %1377 = vmatprep.subr.bf16.mxu1 %v1983_v9  ;;  %v2079_v25 = vld [vmem:[%s2484_s1 + $0xf0] sm:$0xff]   ;;  %v2103_v30 = vld [vmem:[%s2484_s1 + $0xf8] sm:$0xff]   ;;  %v1314_v37 = vld.sshfl [vmem:[%s2483_s0 + $0x4] sm:$0x33 pattern:$0x75316420] }
   0xb   :  { %v2085_v26 = vld [vmem:[%s2484_s1 + $0x30] sm:$0xff]   ;;  %v2109_v31 = vld [vmem:[%s2484_s1 + $0x38] sm:$0xff]  }
   0xc   :  { %1356 = vmatpush3.bf16.msra.mxu0 %v1989_v10  ;;  %v2091_v27 = vld [vmem:[%s2484_s1 + $0xb0] sm:$0xff]   ;;  %v2115_v32 = vld [vmem:[%s2484_s1 + $0xb8] sm:$0xff]  }
   0xd   :  { %1378 = vmatpush3.bf16.msra.mxu1 %v1995_v11  ;;  %1357 = vmatprep.subr.bf16.mxu0 %v2001_v12 }
   0xe   :  { %1379 = vmatprep.subr.bf16.mxu1 %v2007_v13 }
  0x10   :  { %1358 = vmatpush3.bf16.msra.mxu0 %v2013_v14 }
  0x11   :  { %1380 = vmatpush3.bf16.msra.mxu1 %v2019_v15  ;;  %1359 = vmatprep.subr.bf16.mxu0 %v2025_v16 }
  0x12   :  { %1381 = vmatprep.subr.bf16.mxu1 %v2031_v17 }
  0x14   :  { %1360 = vmatpush3.bf16.msra.mxu0 %v2037_v18 }
  0x15   :  { %1382 = vmatpush3.bf16.msra.mxu1 %v2043_v19  ;;  %1361 = vmatprep.subr.bf16.mxu0 %v2049_v20 }
  0x16   :  { %1383 = vmatprep.subr.bf16.mxu1 %v2055_v21 }
  0x18   :  { %1362 = vmatpush3.bf16.msra.mxu0 %v2061_v22 }
  0x19   :  { %1384 = vmatpush3.bf16.msra.mxu1 %v2067_v23  ;;  %1363 = vmatprep.subr.bf16.mxu0 %v2073_v24 }
  0x1a   :  { %1385 = vmatprep.subr.bf16.mxu1 %v2079_v25 }
  0x1c   :  { %1364 = vmatpush3.bf16.msra.mxu0 %v2085_v26 }
  0x1d   :  { %1386 = vmatpush3.bf16.msra.mxu1 %v2091_v27  ;;  %1365 = vmatprep.subr.bf16.mxu0 %v2097_v29 }
  0x1e   :  { %1387 = vmatprep.subr.bf16.mxu1 %v2103_v30 }
  0x20   :  { %1366 = vmatpush3.bf16.msra.mxu0 %v2109_v31 }
  0x21   :  { %1388 = vmatpush3.bf16.msra.mxu1 %v2115_v32  ;;  %1395 = vmatprep.subr.bf16.mxu0 %v1930_v0 }
  0x22   :  { %14 = vsyncpa [#allocation3], 0  ;;  %1417 = vmatprep.subr.bf16.mxu1 %v1935_v1  ;;  %v114_v38 = vcombine.high %v1280_v34, %v1280_v34  ;;  %v117_v39 = vunpack.c.0.s8 %v116_v36  ;;  %v426_v40 = vcombine.high %v1314_v37, %v1314_v37  ;;  %v408_v50 = vld [vmem:[%s2486_s3] sm:$0xff]  ;;  %v409_v51 = vld [vmem:[%s2486_s3 + $0x8] sm:$0xff]  ;;  %v1873_v53 = vmov 0.0|0.0   ;;  %s1876_s16 = smov [#allocation2]  }
  0x23   :  { %v1732_v52 = vpack.c.bf16 %v409_v51, %v408_v50  ;;  %v410_v54 = vld [vmem:[%s2486_s3 + $0x10] sm:$0xff]  ;;  %v411_v55 = vld [vmem:[%s2486_s3 + $0x18] sm:$0xff]  ;;  %v412_v57 = vld [vmem:[%s2486_s3 + $0x20] sm:$0xff]  ;;  %vm1874_vm0 = vmmov 0   ;;  %v1875_v59 = vmov 0.0   ;;  %vm537_vm1 = vcmask 523264  }
  0x24   :  { %v2127_v41 = vsub.s32 %v117_v39, %v119_v33  ;;  %v1735_v56 = vpack.c.bf16 %v411_v55, %v410_v54  ;;  %v413_v58 = vld [vmem:[%s2486_s3 + $0x28] sm:$0xff]  ;;  %v414_v61 = vld [vmem:[%s2486_s3 + $0x30] sm:$0xff]  ;;  %v415_v62 = vld [vmem:[%s2486_s3 + $0x38] sm:$0xff]  ;;  %s1271_s17 = sshll.u32 %s1876_s16, 4  ;;  %vm1263_vm2 = vcmask 74752   ;;  %s1272_s17 = int_to_ptr.vmem [resolvable:$true] %s1271_s17 }
  0x25   :  { %v1738_v60 = vpack.c.bf16 %v413_v58, %v412_v57  ;;  %v1741_v63 = vpack.c.bf16 %v415_v62, %v414_v61  ;;  %v1315_v28 = vld [vmem:[%s2486_s3 + $0x40] sm:$0xff]  ;;  %v1316_v33 = vld [vmem:[%s2486_s3 + $0x48] sm:$0xff]  ;;  %v1317_v35 = vld [vmem:[%s2486_s3 + $0x50] sm:$0xff]  ;;  %p1853_p1 = scmp.lt.s32.totalorder %s1272_s17, %s1272_s17 }
  0x26   :  { %v128_v42 = vrot.slane %v114_v38, %v2127_v41  ;;  %v121_v43 = vrot.slane %v1280_v34, %v2127_v41  ;;  %v440_v44 = vrot.slane %v426_v40, %v2127_v41  ;;  %v433_v48 = vrot.slane %v1314_v37, %v2127_v41  ;;  %v1318_v36 = vld [vmem:[%s2486_s3 + $0x58] sm:$0xff]  ;;  %v1319_v38 = vld [vmem:[%s2486_s3 + $0x60] sm:$0xff]  ;;  %v1320_v39 = vld [vmem:[%s2486_s3 + $0x68] sm:$0xff] }
  0x27   :  { %v1720_v34 = vpack.c.bf16 %v1316_v33, %v1315_v28  ;;  %v1723_v37 = vpack.c.bf16 %v1318_v36, %v1317_v35  ;;  %v1726_v40 = vpack.c.bf16 %v1320_v39, %v1319_v38  ;;  %v1326_v58 = vld.sshfl [vmem:[%s2483_s0 + $0x8] sm:$0x33 pattern:$0x75316420] }
  0x28   :  { %359 = vmatprep.mubr.bf16.mxu0 %v128_v42  ;;  %v130_v45 = vcombine.high %v128_v42, %v128_v42  ;;  %v129_v46 = vcombine.high %v121_v43, %v121_v43  ;;  %v442_v47 = vcombine.high %v440_v44, %v440_v44  ;;  %v441_v49 = vcombine.high %v433_v48, %v433_v48  ;;  %v1321_v42 = vld [vmem:[%s2486_s3 + $0x70] sm:$0xff] }
  0x29   :  { %360 = vmatmul.mubr.bf16.vlgmr.msra.gmra.mrb[0].mxu0 %v121_v43  ;;  %v1322_v43 = vld [vmem:[%s2486_s3 + $0x78] sm:$0xff]  ;;  %v694_v61 = vcombine.high %v1326_v58, %v1326_v58 }
  0x2a   :  { %399 = vmatprep.mubr.bf16.mxu1 %v130_v45  ;;  %1396 = vmatpush3.bf16.msra.mxu0 %v1941_v2 }
  0x2b   :  { %400 = vmatmul.mubr.bf16.vlgmr.msra.gmra.mrb[0].mxu1 %v129_v46  ;;  %1397 = vmatprep.subr.bf16.mxu0 %v1953_v4  ;;  %v2228_v46 = vld [vmem:[%s2485_s2] ss:$0 sm:$0xff]  ;;  %v708_v62 = vrot.slane %v694_v61, %v2127_v41 }
  0x2c   :  { %1418 = vmatpush3.bf16.msra.mxu1 %v1947_v3  ;;  %479 = vmatprep.mubr.bf16.mxu0 %v440_v44  ;;  %v1729_v44 = vpack.c.bf16 %v1322_v43, %v1321_v42 }
  0x2d   :  { %1419 = vmatprep.subr.bf16.mxu1 %v1959_v5  ;;  %519 = vmatprep.mubr.bf16.mxu1 %v442_v47 }
  0x2e   :  { %1398 = vmatpush3.bf16.msra.mxu0 %v1965_v6 }
  0x2f   :  { %1399 = vmatprep.subr.bf16.mxu0 %v1977_v8 }
  0x30   :  { %1420 = vmatpush3.bf16.msra.mxu1 %v1971_v7 }
  0x31   :  { %1421 = vmatprep.subr.bf16.mxu1 %v1983_v9 }
  0x32   :  { %1400 = vmatpush3.bf16.msra.mxu0 %v1989_v10 }
  0x33   :  { %1401 = vmatprep.subr.bf16.mxu0 %v2001_v12 }
  0x34   :  { %1422 = vmatpush3.bf16.msra.mxu1 %v1995_v11 }
  0x35   :  { %1423 = vmatprep.subr.bf16.mxu1 %v2007_v13 }
  0x36   :  { %1402 = vmatpush3.bf16.msra.mxu0 %v2013_v14 }
  0x37   :  { %1403 = vmatprep.subr.bf16.mxu0 %v2025_v16 }
  0x38   :  { %1424 = vmatpush3.bf16.msra.mxu1 %v2019_v15 }
  0x39   :  { %1425 = vmatprep.subr.bf16.mxu1 %v2031_v17 }
  0x3a   :  { %1404 = vmatpush3.bf16.msra.mxu0 %v2037_v18 }
  0x3b   :  { %1405 = vmatprep.subr.bf16.mxu0 %v2049_v20 }
  0x3c   :  { %1426 = vmatpush3.bf16.msra.mxu1 %v2043_v19 }
  0x3d   :  { %1427 = vmatprep.subr.bf16.mxu1 %v2055_v21 }
  0x3e   :  { %1406 = vmatpush3.bf16.msra.mxu0 %v2061_v22 }
  0x3f   :  { %1407 = vmatprep.subr.bf16.mxu0 %v2073_v24 }
  0x40   :  { %1428 = vmatpush3.bf16.msra.mxu1 %v2067_v23 }
  0x41   :  { %1429 = vmatprep.subr.bf16.mxu1 %v2079_v25 }
  0x42   :  { %1408 = vmatpush3.bf16.msra.mxu0 %v2085_v26 }
  0x43   :  { %1409 = vmatprep.subr.bf16.mxu0 %v2097_v29 }
  0x44   :  { %1430 = vmatpush3.bf16.msra.mxu1 %v2091_v27 }
  0x45   :  { %1431 = vmatprep.subr.bf16.mxu1 %v2103_v30 }
  0x46   :  { %1410 = vmatpush3.bf16.msra.mxu0 %v2109_v31 }
  0x47   :  { %1719 = vmatprep.subr.bf16.mxu0 %v1873_v53 }
  0x48   :  { %1432 = vmatpush3.bf16.msra.mxu1 %v2115_v32 }
  0x49   :  { %480 = vmatmul.mubr.bf16.vlgmr.msra.gmra.mrb[4].mxu0 %v433_v48  ;;  %1731 = vmatprep.subr.bf16.mxu1 %v1873_v53 }
  0x4a   :  { %1605 = vmatprep.mubr.msk.f32.mxu0 %vm1874_vm0, %v1875_v59  ;;  %1721 = vmatpush3.bf16.msra.mxu0 %v1720_v34 }
  0x4b   :  { %520 = vmatmul.mubr.bf16.vlgmr.msra.gmra.mrb[4].mxu1 %v441_v49  ;;  %1722 = vmatprep.subr.bf16.mxu0 %v1873_v53 }
  0x4c   :  { %1733 = vmatpush3.bf16.msra.mxu1 %v1732_v52  ;;  %1624 = vmatprep.mubr.msk.f32.mxu1 %vm1874_vm0, %v1875_v59 }
  0x4d   :  { %1734 = vmatprep.subr.bf16.mxu1 %v1873_v53 }
  0x4e   :  { %1724 = vmatpush3.bf16.msra.mxu0 %v1723_v37 }
  0x4f   :  { %1725 = vmatprep.subr.bf16.mxu0 %v1873_v53 }
  0x50   :  { %1736 = vmatpush3.bf16.msra.mxu1 %v1735_v56 }
  0x51   :  { %1737 = vmatprep.subr.bf16.mxu1 %v1873_v53 }
  0x52   :  { %1727 = vmatpush3.bf16.msra.mxu0 %v1726_v40 }
  0x53   :  { %1728 = vmatprep.subr.bf16.mxu0 %v1873_v53 }
  0x54   :  { %1739 = vmatpush3.bf16.msra.mxu1 %v1738_v60 }
  0x55   :  { %1740 = vmatprep.subr.bf16.mxu1 %v1873_v53 }
  0x56   :  { %1730 = vmatpush3.bf16.msra.mxu0 %v1729_v44 }
  0x57   :  { %1457 = vmatprep.subr.bf16.mxu0 %v1930_v0 }
  0x58   :  { %1742 = vmatpush3.bf16.msra.mxu1 %v1741_v63  ;;  %v710_v63 = vcombine.high %v708_v62, %v708_v62 }
  0x59   :  { %1479 = vmatprep.subr.bf16.mxu1 %v1935_v1 }
  0xfc   :  { %v1367_v45 = vpop.f32.mrb[0].mxu0 }
  0xfd   :  { %v1368_v47 = vpop.f32.mrb[1].mxu0 }
  0xfe   :  { %v1389_v48 = vpop.f32.mrb[0].mxu1  ;;  %v1369_v49 = vadd.f32 %v1368_v47, %v1367_v45  ;;  %v1370_v50 = vpop.f32.mrb[2].mxu0  ;;  %v701_v47 = vrot.slane %v1326_v58, %v2127_v41 }
  0xff   :  { %v1390_v51 = vpop.f32.mrb[1].mxu1  ;;  %v1371_v52 = vpop.f32.mrb[3].mxu0 }
 0x100   :  { %v362_v54 = vadd.f32 %v1369_v49, %v2228_v46  ;;  %v1391_v55 = vadd.f32 %v1390_v51, %v1389_v48  ;;  %v1392_v56 = vpop.f32.mrb[2].mxu1  ;;  %v709_v48 = vcombine.high %v701_v47, %v701_v47 }
 0x101   :  { %v1393_v57 = vpop.f32.mrb[3].mxu1 }
 0x102   :  { %v402_v60 = vadd.f32 %v1391_v55, %v362_v54 }
 0x104   :  { %1840 = vtanh.f32 %v402_v60 }
 0x10e   :  { %v1841_v28 = vpop.eup %1840 }
 0x10f   :  { %1625 = vmatmul.mubr.msk.f32.vlgmr.msra.gmra.mrb[8].mxu1 %vm537_vm1, %v1841_v28 }
 0x110   :  { %1480 = vmatpush3.bf16.msra.mxu1 %v1947_v3  ;;  %787 = vmatprep.mubr.bf16.mxu1 %v710_v63 }
 0x111   :  { %1481 = vmatprep.subr.bf16.mxu1 %v1959_v5 }
 0x114   :  { %1482 = vmatpush3.bf16.msra.mxu1 %v1971_v7 }
 0x115   :  { %1483 = vmatprep.subr.bf16.mxu1 %v1983_v9 }
 0x118   :  { %1484 = vmatpush3.bf16.msra.mxu1 %v1995_v11 }
 0x119   :  { %1485 = vmatprep.subr.bf16.mxu1 %v2007_v13 }
 0x11c   :  { %v1411_v33 = vpop.f32.mrb[4].mxu0  ;;  %1486 = vmatpush3.bf16.msra.mxu1 %v2019_v15 }
 0x11d   :  { %v1412_v34 = vpop.f32.mrb[5].mxu0  ;;  %1487 = vmatprep.subr.bf16.mxu1 %v2031_v17 }
 0x11e   :  { %v1433_v35 = vpop.f32.mrb[4].mxu1  ;;  %v1413_v36 = vadd.f32 %v1412_v34, %v1411_v33  ;;  %v1414_v37 = vpop.f32.mrb[6].mxu0 }
 0x11f   :  { %v1434_v38 = vpop.f32.mrb[5].mxu1  ;;  %v1415_v39 = vpop.f32.mrb[7].mxu0  ;;  %v1344_v37 = vld [vmem:[%s2486_s3 + $0xf0] sm:$0xff] }
 0x120   :  { %v482_v40 = vadd.f32 %v1413_v36, %v2228_v46  ;;  %v1435_v42 = vadd.f32 %v1434_v38, %v1433_v35  ;;  %v1436_v43 = vpop.f32.mrb[6].mxu1  ;;  %1488 = vmatpush3.bf16.msra.mxu1 %v2043_v19  ;;  %v1345_v38 = vld [vmem:[%s2486_s3 + $0xf8] sm:$0xff] }
 0x121   :  { %v1437_v44 = vpop.f32.mrb[7].mxu1  ;;  %1489 = vmatprep.subr.bf16.mxu1 %v2055_v21  ;;  %v1765_v39 = vpack.c.bf16 %v1345_v38, %v1344_v37  ;;  %v1084_v43 = vld [vmem:[%s2488_s5 + $0x10] sm:$0xff] }
 0x122   :  { %v522_v45 = vadd.f32 %v1435_v42, %v482_v40  ;;  %v1082_v40 = vld [vmem:[%s2488_s5] sm:$0xff]  ;;  %v1083_v42 = vld [vmem:[%s2488_s5 + $0x8] sm:$0xff] }
 0x123   :  { %v1768_v44 = vpack.c.bf16 %v1083_v42, %v1082_v40 }
 0x124   :  { %1842 = vtanh.f32 %v522_v45  ;;  %1490 = vmatpush3.bf16.msra.mxu1 %v2067_v23  ;;  %v1085_v45 = vld [vmem:[%s2488_s5 + $0x18] sm:$0xff] }
 0x125   :  { %1491 = vmatprep.subr.bf16.mxu1 %v2079_v25 }
 0x128   :  { %1492 = vmatpush3.bf16.msra.mxu1 %v2091_v27 }
 0x129   :  { %1493 = vmatprep.subr.bf16.mxu1 %v2103_v30 }
 0x12c   :  { %1494 = vmatpush3.bf16.msra.mxu1 %v2115_v32 }
 0x12d   :  { %1510 = vmatprep.subr.bf16.mxu1 %v1930_v0  ;;  %v1327_v0 = vld [vmem:[%s2486_s3 + $0x80] sm:$0xff] }
 0x12e   :  { %v1843_v49 = vpop.eup %1842 }
 0x12f   :  { %1606 = vmatmul.mubr.msk.f32.vlgmr.msra.gmra.mrb[8].mxu0 %vm537_vm1, %v1843_v49  ;;  %788 = vmatmul.mubr.bf16.vlgmr.msra.gmra.mrb[12].mxu1 %v709_v48  ;;  %v1086_v48 = vld [vmem:[%s2488_s5 + $0x20] sm:$0xff]  ;;  %v1087_v49 = vld [vmem:[%s2488_s5 + $0x28] sm:$0xff] }
 0x130   :  { %1458 = vmatpush3.bf16.msra.mxu0 %v1941_v2  ;;  %747 = vmatprep.mubr.bf16.mxu0 %v708_v62 }
 0x131   :  { %1459 = vmatprep.subr.bf16.mxu0 %v1953_v4  ;;  %1511 = vmatpush3.bf16.msra.mxu1 %v1941_v2  ;;  %v1328_v2 = vld [vmem:[%s2486_s3 + $0x88] sm:$0xff] }
 0x132   :  { %1512 = vmatprep.subr.bf16.mxu1 %v1953_v4  ;;  %v1744_v4 = vpack.c.bf16 %v1328_v2, %v1327_v0  ;;  %v1774_v0 = vpack.c.bf16 %v1087_v49, %v1086_v48  ;;  %v1088_v2 = vld [vmem:[%s2488_s5 + $0x30] sm:$0xff] }
 0x134   :  { %1460 = vmatpush3.bf16.msra.mxu0 %v1965_v6 }
 0x135   :  { %1461 = vmatprep.subr.bf16.mxu0 %v1977_v8  ;;  %1513 = vmatpush3.bf16.msra.mxu1 %v1965_v6  ;;  %v1329_v6 = vld [vmem:[%s2486_s3 + $0x90] sm:$0xff] }
 0x136   :  { %1514 = vmatprep.subr.bf16.mxu1 %v1977_v8  ;;  %v1330_v8 = vld [vmem:[%s2486_s3 + $0x98] sm:$0xff] }
 0x138   :  { %1462 = vmatpush3.bf16.msra.mxu0 %v1989_v10 }
 0x139   :  { %1463 = vmatprep.subr.bf16.mxu0 %v2001_v12  ;;  %1515 = vmatpush3.bf16.msra.mxu1 %v1989_v10  ;;  %v1747_v10 = vpack.c.bf16 %v1330_v8, %v1329_v6  ;;  %v1090_v8 = vld [vmem:[%s2488_s5 + $0x40] sm:$0xff] }
 0x13a   :  { %1516 = vmatprep.subr.bf16.mxu1 %v2001_v12  ;;  %v1331_v12 = vld [vmem:[%s2486_s3 + $0xa0] sm:$0xff] }
 0x13c   :  { %1464 = vmatpush3.bf16.msra.mxu0 %v2013_v14 }
 0x13d   :  { %1465 = vmatprep.subr.bf16.mxu0 %v2025_v16  ;;  %1517 = vmatpush3.bf16.msra.mxu1 %v2013_v14  ;;  %v1332_v14 = vld [vmem:[%s2486_s3 + $0xa8] sm:$0xff] }
 0x13e   :  { %1518 = vmatprep.subr.bf16.mxu1 %v2025_v16  ;;  %v1750_v16 = vpack.c.bf16 %v1332_v14, %v1331_v12  ;;  %v1092_v14 = vld [vmem:[%s2488_s5 + $0x50] sm:$0xff] }
 0x140   :  { %1466 = vmatpush3.bf16.msra.mxu0 %v2037_v18 }
 0x141   :  { %1467 = vmatprep.subr.bf16.mxu0 %v2049_v20  ;;  %1519 = vmatpush3.bf16.msra.mxu1 %v2037_v18  ;;  %v1333_v18 = vld [vmem:[%s2486_s3 + $0xb0] sm:$0xff] }
 0x142   :  { %1520 = vmatprep.subr.bf16.mxu1 %v2049_v20  ;;  %v1334_v20 = vld [vmem:[%s2486_s3 + $0xb8] sm:$0xff] }
 0x144   :  { %1468 = vmatpush3.bf16.msra.mxu0 %v2061_v22 }
 0x145   :  { %1469 = vmatprep.subr.bf16.mxu0 %v2073_v24  ;;  %1521 = vmatpush3.bf16.msra.mxu1 %v2061_v22  ;;  %v1753_v22 = vpack.c.bf16 %v1334_v20, %v1333_v18  ;;  %v1094_v20 = vld [vmem:[%s2488_s5 + $0x60] sm:$0xff] }
 0x146   :  { %1522 = vmatprep.subr.bf16.mxu1 %v2073_v24  ;;  %v1337_v24 = vld.sshfl [vmem:[%s2483_s0 + $0xc] sm:$0x33 pattern:$0x75316420] }
 0x148   :  { %1470 = vmatpush3.bf16.msra.mxu0 %v2085_v26 }
 0x149   :  { %1471 = vmatprep.subr.bf16.mxu0 %v2097_v29  ;;  %1523 = vmatpush3.bf16.msra.mxu1 %v2085_v26  ;;  %v889_v26 = vcombine.high %v1337_v24, %v1337_v24 }
 0x14a   :  { %1524 = vmatprep.subr.bf16.mxu1 %v2097_v29 }
 0x14b   :  { %v903_v29 = vrot.slane %v889_v26, %v2127_v41 }
 0x14c   :  { %1472 = vmatpush3.bf16.msra.mxu0 %v2109_v31 }
 0x14d   :  { %1743 = vmatprep.subr.bf16.mxu0 %v1873_v53  ;;  %1525 = vmatpush3.bf16.msra.mxu1 %v2109_v31  ;;  %v896_v31 = vrot.slane %v1337_v24, %v2127_v41  ;;  %v905_v35 = vcombine.high %v903_v29, %v903_v29 }
 0x14e   :  { %1755 = vmatprep.subr.bf16.mxu1 %v1873_v53  ;;  %942 = vmatprep.mubr.bf16.mxu1 %v903_v29 }
 0x14f   :  { %748 = vmatmul.mubr.bf16.vlgmr.msra.gmra.mrb[12].mxu0 %v701_v47  ;;  %v1771_v47 = vpack.c.bf16 %v1085_v45, %v1084_v43 }
 0x150   :  { %1643 = vmatprep.mubr.msk.f32.mxu0 %vm1874_vm0, %v1875_v59  ;;  %1745 = vmatpush3.bf16.msra.mxu0 %v1744_v4  ;;  %v1089_v4 = vld [vmem:[%s2488_s5 + $0x38] sm:$0xff] }
 0x151   :  { %1746 = vmatprep.subr.bf16.mxu0 %v1873_v53  ;;  %943 = vmatmul.mubr.bf16.vlgmr.msra.gmra.mrb[16].mxu1 %v896_v31  ;;  %v1777_v6 = vpack.c.bf16 %v1089_v4, %v1088_v2 }
 0x152   :  { %1662 = vmatprep.mubr.msk.f32.mxu1 %vm1874_vm0, %v1875_v59 }
 0x154   :  { %1748 = vmatpush3.bf16.msra.mxu0 %v1747_v10  ;;  %v1091_v10 = vld [vmem:[%s2488_s5 + $0x48] sm:$0xff] }
 0x155   :  { %1749 = vmatprep.subr.bf16.mxu0 %v1873_v53  ;;  %v1780_v12 = vpack.c.bf16 %v1091_v10, %v1090_v8 }
 0x158   :  { %1751 = vmatpush3.bf16.msra.mxu0 %v1750_v16  ;;  %v1093_v16 = vld [vmem:[%s2488_s5 + $0x58] sm:$0xff] }
 0x159   :  { %1752 = vmatprep.subr.bf16.mxu0 %v1873_v53  ;;  %v1783_v18 = vpack.c.bf16 %v1093_v16, %v1092_v14 }
 0x15c   :  { %1754 = vmatpush3.bf16.msra.mxu0 %v1753_v22  ;;  %v1095_v22 = vld [vmem:[%s2488_s5 + $0x68] sm:$0xff] }
 0x15d   :  { %1532 = vmatprep.subr.bf16.mxu0 %v1935_v1  ;;  %v1786_v24 = vpack.c.bf16 %v1095_v22, %v1094_v20 }
 0x1e2   :  { %v680_v50 = vpop.f32.mrb[8].mxu1 }
 0x1e3   :  { %v1626_v51 = vpop.f32.mrb[9].mxu1 }
 0x202   :  { %v607_v52 = vpop.f32.mrb[8].mxu0  ;;  %v1495_v54 = vpop.f32.mrb[12].mxu1 }
 0x203   :  { %v2324_v55 = vadd.f32 %v680_v50, %v607_v52  ;;  %v1607_v1 = vpop.f32.mrb[9].mxu0  ;;  %v1496_v56 = vpop.f32.mrb[13].mxu1 }
 0x204   :  { %v1497_v57 = vadd.f32 %v1496_v56, %v1495_v54  ;;  %v1498_v58 = vpop.f32.mrb[14].mxu1 }
 0x205   :  { %v1499_v60 = vpop.f32.mrb[15].mxu1 }
 0x222   :  { %v1473_v61 = vpop.f32.mrb[12].mxu0 }
 0x223   :  { %v1474_v62 = vpop.f32.mrb[13].mxu0 }
 0x224   :  { %v1475_v63 = vadd.f32 %v1474_v62, %v1473_v61  ;;  %v1476_v41 = vpop.f32.mrb[14].mxu0  ;;  %v1175_v61 = vld [vmem:[%s2490_s7] sm:$0xff]  ;;  %v1176_v62 = vld [vmem:[%s2490_s7 + $0x8] sm:$0xff] }
 0x225   :  { %v1477_v28 = vpop.f32.mrb[15].mxu0  ;;  %v1178_v41 = vld [vmem:[%s2490_s7 + $0x18] sm:$0xff] }
 0x226   :  { %v750_v33 = vadd.f32 %v1475_v63, %v2228_v46  ;;  %v1792_v63 = vpack.c.bf16 %v1176_v62, %v1175_v61 }
 0x228   :  { %v790_v34 = vadd.f32 %v1497_v57, %v750_v33  ;;  %v1179_v33 = vld [vmem:[%s2490_s7 + $0x20] sm:$0xff] }
 0x22a   :  { %1844 = vtanh.f32 %v790_v34  ;;  %v1180_v34 = vld [vmem:[%s2490_s7 + $0x28] sm:$0xff] }
 0x234   :  { %v1845_v36 = vpop.eup %1844 }
 0x235   :  { %1644 = vmatmul.mubr.msk.f32.vlgmr.msra.gmra.mrb[10].mxu0 %vm537_vm1, %v1845_v36 }
 0x236   :  { %1533 = vmatpush3.bf16.msra.mxu0 %v1947_v3  ;;  %982 = vmatprep.mubr.bf16.mxu0 %v905_v35  ;;  %v904_v3 = vcombine.high %v896_v31, %v896_v31  ;;  %v1798_v35 = vpack.c.bf16 %v1180_v34, %v1179_v33 }
 0x237   :  { %1534 = vmatprep.subr.bf16.mxu0 %v1959_v5  ;;  %v1526_v5 = vpop.f32.mrb[16].mxu1 }
 0x23a   :  { %1535 = vmatpush3.bf16.msra.mxu0 %v1971_v7  ;;  %v1527_v7 = vpop.f32.mrb[17].mxu1 }
 0x23b   :  { %1536 = vmatprep.subr.bf16.mxu0 %v1983_v9  ;;  %v1528_v9 = vadd.f32 %v1527_v7, %v1526_v5 }
 0x23d   :  { %v945_v50 = vadd.f32 %v1528_v9, %v2228_v46  ;;  %v1097_v46 = vld [vmem:[%s2488_s5 + $0x78] sm:$0xff] }
 0x23e   :  { %1537 = vmatpush3.bf16.msra.mxu0 %v1995_v11  ;;  %v1529_v11 = vpop.f32.mrb[18].mxu1 }
 0x23f   :  { %1538 = vmatprep.subr.bf16.mxu0 %v2007_v13  ;;  %v1530_v13 = vpop.f32.mrb[19].mxu1  ;;  %v1181_v11 = vld [vmem:[%s2490_s7 + $0x30] sm:$0xff] }
 0x240   :  { %v1182_v13 = vld [vmem:[%s2490_s7 + $0x38] sm:$0xff] }
 0x242   :  { %1539 = vmatpush3.bf16.msra.mxu0 %v2019_v15  ;;  %v1338_v15 = vld [vmem:[%s2486_s3 + $0xc0] sm:$0xff] }
 0x243   :  { %1540 = vmatprep.subr.bf16.mxu0 %v2031_v17  ;;  %v1339_v17 = vld [vmem:[%s2486_s3 + $0xc8] sm:$0xff] }
 0x246   :  { %1541 = vmatpush3.bf16.msra.mxu0 %v2043_v19  ;;  %v1756_v19 = vpack.c.bf16 %v1339_v17, %v1338_v15  ;;  %v1801_v15 = vpack.c.bf16 %v1182_v13, %v1181_v11 }
 0x247   :  { %1542 = vmatprep.subr.bf16.mxu0 %v2055_v21  ;;  %v1340_v21 = vld [vmem:[%s2486_s3 + $0xd0] sm:$0xff] }
 0x248   :  { %1757 = vmatpush3.bf16.msra.mxu1 %v1756_v19 }
 0x249   :  { %1758 = vmatprep.subr.bf16.mxu1 %v1873_v53 }
 0x24a   :  { %1543 = vmatpush3.bf16.msra.mxu0 %v2067_v23  ;;  %v1341_v23 = vld [vmem:[%s2486_s3 + $0xd8] sm:$0xff] }
 0x24b   :  { %1544 = vmatprep.subr.bf16.mxu0 %v2079_v25  ;;  %v1759_v25 = vpack.c.bf16 %v1341_v23, %v1340_v21  ;;  %v1349_v23 = vld [vmem:[%s2491_s8] ss:$0 sm:$0xff] }
 0x24d   :  { %1760 = vmatpush3.bf16.msra.mxu1 %v1759_v25 }
 0x24e   :  { %1545 = vmatpush3.bf16.msra.mxu0 %v2091_v27  ;;  %v1342_v27 = vld [vmem:[%s2486_s3 + $0xe0] sm:$0xff]  ;;  %1761 = vmatprep.subr.bf16.mxu1 %v1873_v53 }
 0x24f   :  { %1546 = vmatprep.subr.bf16.mxu0 %v2103_v30  ;;  %v1343_v30 = vld [vmem:[%s2486_s3 + $0xe8] sm:$0xff] }
 0x252   :  { %1547 = vmatpush3.bf16.msra.mxu0 %v2115_v32  ;;  %v1762_v32 = vpack.c.bf16 %v1343_v30, %v1342_v27 }
 0x253   :  { %1767 = vmatprep.subr.bf16.mxu0 %v1873_v53 }
 0x254   :  { %1763 = vmatpush3.bf16.msra.mxu1 %v1762_v32 }
 0x255   :  { %983 = vmatmul.mubr.bf16.vlgmr.msra.gmra.mrb[16].mxu0 %v904_v3  ;;  %1764 = vmatprep.subr.bf16.mxu1 %v1873_v53  ;;  %v1347_v3 = vld [vmem:[%s2487_s4] ss:$0 sm:$0xff] }
 0x256   :  { %1697 = vmatprep.mubr.msk.f32.mxu0 %vm1874_vm0, %v1875_v59  ;;  %1769 = vmatpush3.bf16.msra.mxu0 %v1768_v44 }
 0x257   :  { %1770 = vmatprep.subr.bf16.mxu0 %v1873_v53 }
 0x258   :  { %1766 = vmatpush3.bf16.msra.mxu1 %v1765_v39 }
 0x259   :  { %1791 = vmatprep.subr.bf16.mxu1 %v1873_v53 }
 0x25a   :  { %1772 = vmatpush3.bf16.msra.mxu0 %v1771_v47 }
 0x25b   :  { %1773 = vmatprep.subr.bf16.mxu0 %v1873_v53 }
 0x25e   :  { %1775 = vmatpush3.bf16.msra.mxu0 %v1774_v0 }
 0x25f   :  { %1776 = vmatprep.subr.bf16.mxu0 %v1873_v53 }
 0x262   :  { %1778 = vmatpush3.bf16.msra.mxu0 %v1777_v6 }
 0x263   :  { %1779 = vmatprep.subr.bf16.mxu0 %v1873_v53 }
 0x266   :  { %1781 = vmatpush3.bf16.msra.mxu0 %v1780_v12 }
 0x267   :  { %1782 = vmatprep.subr.bf16.mxu0 %v1873_v53 }
 0x26a   :  { %1784 = vmatpush3.bf16.msra.mxu0 %v1783_v18 }
 0x26b   :  { %1785 = vmatprep.subr.bf16.mxu0 %v1873_v53 }
 0x26e   :  { %1787 = vmatpush3.bf16.msra.mxu0 %v1786_v24 }
 0x26f   :  { %1788 = vmatprep.subr.bf16.mxu0 %v1873_v53 }
 0x308   :  { %v874_v26 = vpop.f32.mrb[10].mxu0 }
 0x309   :  { %v878_v29 = vadd.f32 %v874_v26, %v2324_v55  ;;  %v1645_v31 = vpop.f32.mrb[11].mxu0  ;;  %v1096_v55 = vld [vmem:[%s2488_s5 + $0x70] sm:$0xff] }
 0x30a   :  { %v1789_v60 = vpack.c.bf16 %v1097_v46, %v1096_v55 }
 0x30c   :  { %1790 = vmatpush3.bf16.msra.mxu0 %v1789_v60 }
 0x328   :  { %v1548_v51 = vpop.f32.mrb[16].mxu0 }
 0x329   :  { %v1549_v52 = vpop.f32.mrb[17].mxu0 }
 0x32a   :  { %v1550_v54 = vadd.f32 %v1549_v52, %v1548_v51  ;;  %v1551_v1 = vpop.f32.mrb[18].mxu0 }
 0x32b   :  { %v1552_v56 = vpop.f32.mrb[19].mxu0 }
 0x32c   :  { %v985_v57 = vadd.f32 %v1550_v54, %v945_v50 }
 0x32e   :  { %1846 = vtanh.f32 %v985_v57 }
 0x338   :  { %v1847_v58 = vpop.eup %1846 }
 0x339   :  { %1663 = vmatmul.mubr.msk.f32.vlgmr.msra.gmra.mrb[10].mxu1 %vm537_vm1, %v1847_v58 }
 0x33a   :  { %1716 = vmatprep.mubr.msk.f32.mxu1 %vm1874_vm0, %v1875_v59  ;;  %v1177_v59 = vld [vmem:[%s2490_s7 + $0x10] sm:$0xff]  ;;  %1793 = vmatpush3.bf16.msra.mxu1 %v1792_v63  ;;  %s1848_s7 = scalar_lea.vmem %s1272_s17, 32 }
 0x33b   :  { %v1795_v28 = vpack.c.bf16 %v1178_v41, %v1177_v59  ;;  %1794 = vmatprep.subr.bf16.mxu1 %v1873_v53  ;;  %p1849_p0 = scmp.ne.s32.totalorder %s1272_s17, %s1848_s7  ;;  %p1854_p2 = scmp.lt.s32.totalorder %s1848_s7, %s1848_s7 }
 0x33d   :  { %p1855_p3 = por %p1854_p2, %p1853_p1 }
 0x33e   :  { %1796 = vmatpush3.bf16.msra.mxu1 %v1795_v28 }
 0x33f   :  { %1797 = vmatprep.subr.bf16.mxu1 %v1873_v53  ;;  %p1856_p4 = pnand %p1855_p3, %p1849_p0 }
 0x342   :  { %1799 = vmatpush3.bf16.msra.mxu1 %v1798_v35 }
 0x343   :  { %1800 = vmatprep.subr.bf16.mxu1 %v1873_v53  ;;  %v1348_v53 = vld [vmem:[%s2489_s6] ss:$0 sm:$0xff] }
 0x346   :  { %1802 = vmatpush3.bf16.msra.mxu1 %v1801_v15 }
 0x40c   :  { %v1069_v36 = vpop.f32.mrb[10].mxu1 }
 0x40d   :  { %v1073_v5 = vadd.f32 %v1069_v36, %v878_v29  ;;  %v1664_v7 = vpop.f32.mrb[11].mxu1 }
 0x40f   :  { %v1081_v9 = vadd.f32 %v1347_v3, %v1073_v5 }
 0x411   :  { %1698 = vmatmul.mubr.f32.vlgmr.msra.gmra.mrb[20].mxu0 %v1081_v9 }
 0x4e4   :  { %v1171_v17 = vpop.f32.mrb[20].mxu0 }
 0x4e5   :  { %v1172_v19 = vadd.f32 %v1348_v53, %v1171_v17  ;;  %v1699_v21 = vpop.f32.mrb[21].mxu0 }
 0x4e7   :  { %1717 = vmatmul.mubr.msk.f32.vlgmr.msra.gmra.mrb[20].mxu1 %vm537_vm1, %v1172_v19 }
 0x5ba   :  { %v1259_v25 = vpop.f32.mrb[20].mxu1 }
 0x5bb   :  { %v1260_v27 = vadd.f32 %v1349_v23, %v1259_v25  ;;  %v1718_v30 = vpop.f32.mrb[21].mxu1 }
 0x5bd   :  { %1264 = vst.msk [vmem:[#allocation2] sm:$0x3] %vm1263_vm2, %v1260_v27 }
 0x5be   :  { %1859 = shalt.err (!%p1856_p4)
}
 0x5bf   :  { %s1860_s19 = scalar_lea.hbm %s2492_s9, 32 }
 0x5c0   :  { %p1861_p5 = scmp.ne.s32.totalorder %s2492_s9, %s1860_s19  ;;  %p1864_p6 = scmp.lt.u32.totalorder %s1860_s19, %s2492_s9 }
 0x5c2   :  { %p1866_p7 = pnand %p1864_p6, %p1861_p5 }
 0x5c4   :  { %1869 = shalt.err (!%p1866_p7)
}
 0x5c5   :  { %1274 = dma.vmem_to_hbm [thread:$0]  %s1272_s17, 32, %s2492_s9, [#allocation3]  }
 0x5c6   :  { %1870 = dma.done.wait [#allocation3], 32  }
 0x5c7   :  { %1871 = vsyncadd [#allocation3], 4294967264 }
 0x5c8   :  { %1278 = vsyncpa [#allocation3], 1 }

</bundles_post_ra>
